<compile_context>
chip_gen: v7x
topology: tpu7x:2x2x1
jax: 0.10.0
libtpu: 0.0.40
codegen_flags: <defaults>
</compile_context>

<pallas_src>
import functools

import jax
import jax.numpy as jnp
from jax.experimental import pallas as pl
from jax.experimental.pallas import tpu as pltpu


def _build_hidden_dims(input_dim: int, num_hid: int):
    """Mirror Attn_MLP_Discriminator.build_layers hidden-dim schedule."""
    hidden_dims = [input_dim]
    while hidden_dims[-1] > 1 and len(hidden_dims) < num_hid + 1:
        hidden_dims.append(hidden_dims[-1] // 2)
    return hidden_dims


def _round_up(n: int, m: int) -> int:
    return ((n + m - 1) // m) * m


def _make_kernel(*, input_dim: int, dp: int, n_hidden: int, last_dim: int, out_w: int):
    """Kernel factory; all shape knowledge is baked in as Python constants."""

    def kernel(x_ref, w_ref, v_ref, o_ref):
        tb = x_ref.shape[0]
        x = x_ref[...]  # (tb, input_dim) f32

        # Pad the feature axis to dp lanes once (same vreg count; keeps everything dense).
        if input_dim < dp:
            x = jnp.concatenate(
                [x, jnp.zeros((tb, dp - input_dim), jnp.float32)], axis=1)
        col = jax.lax.broadcasted_iota(jnp.int32, (tb, dp), 1)

        # --- attention branch: relu -> softmax(dim=1) -> elementwise gate ---
        za = jnp.dot(x.astype(jnp.bfloat16), w_ref[0:dp, :],
                     preferred_element_type=jnp.float32)
        za = jnp.maximum(za + v_ref[0:1, :], 0.0)          # pad lanes stay exactly 0
        m = jnp.max(za, axis=1, keepdims=True)             # relu >= 0, so pads can't win
        e = jnp.where(col < input_dim, jnp.exp(za - m), 0.0)
        attn = e / jnp.sum(e, axis=1, keepdims=True)       # exact divide (accuracy)
        h = x * attn                                        # pad lanes: attn == 0 -> 0

        # --- shared MLP trunk: Linear -> LeakyReLU(0.2) -> Dropout(identity) ---
        for li in range(n_hidden):
            r0 = (li + 1) * dp
            z = jnp.dot(h.astype(jnp.bfloat16), w_ref[r0:r0 + dp, :],
                        preferred_element_type=jnp.float32)
            z = z + v_ref[li + 1:li + 2, :]                 # padded bias lanes are 0
            h = jnp.maximum(z, 0.2 * z)                     # LeakyReLU(0.2), single vmax

        # --- final Linear(last_dim, 1) + Sigmoid: VPU multiply + lane reduce ---
        wf_row = v_ref[n_hidden + 1:n_hidden + 2, :]        # (1, dp), zeros beyond last_dim
        bf_row = v_ref[n_hidden + 2:n_hidden + 3, :]
        d = jnp.sum(h * wf_row, axis=1, keepdims=True) + bf_row[:, :1]
        sig = 1.0 / (1.0 + jnp.exp(-d))                     # exact sigmoid

        # --- single lane-dense output tile: lanes [0:last_dim] = h, lane last_dim = sig ---
        if out_w == dp:
            h_out, col_out = h, col
        elif out_w < dp:
            h_out, col_out = h[:, :out_w], col[:, :out_w]
        else:
            h_out = jnp.concatenate(
                [h, jnp.zeros((tb, out_w - dp), jnp.float32)], axis=1)
            col_out = jax.lax.broadcasted_iota(jnp.int32, (tb, out_w), 1)
        o_ref[...] = jnp.where(col_out == last_dim, sig, h_out).astype(o_ref.dtype)

    return kernel


def _pack_params(params, *, input_dim: int, dp: int, hidden_dims):
    """Pack all parameters into two grid-invariant slabs (one DMA each).

    w_slab (bf16): (n_hidden+1) vertically stacked (dp, dp) blocks, each weight
                   zero-padded in rows and cols.
    v_slab (f32) : rows = [ba, b1..bn, wf^T, bf], each zero-padded to dp lanes.
    """
    blocks = [jnp.zeros((dp, dp), jnp.float32)
              .at[:input_dim, :input_dim].set(params["wa"].astype(jnp.float32))]
    for (w, _b) in params["hidden"]:
        fi, fo = w.shape
        blocks.append(jnp.zeros((dp, dp), jnp.float32).at[:fi, :fo].set(w))
    w_slab = jnp.concatenate(blocks, axis=0).astype(jnp.bfloat16)

    rows = [jnp.zeros((dp,), jnp.float32).at[:input_dim].set(params["ba"].reshape(-1))]
    for (_w, b) in params["hidden"]:
        bb = b.reshape(-1)
        rows.append(jnp.zeros((dp,), jnp.float32).at[:bb.shape[0]].set(bb))
    last_dim = hidden_dims[-1]
    rows.append(jnp.zeros((dp,), jnp.float32).at[:last_dim].set(params["wf"].reshape(-1)))
    rows.append(jnp.zeros((dp,), jnp.float32).at[0].set(params["bf"].reshape(-1)[0]))
    v_slab = jnp.stack(rows, axis=0)
    pad = _round_up(v_slab.shape[0], 8) - v_slab.shape[0]
    if pad:
        v_slab = jnp.concatenate([v_slab, jnp.zeros((pad, dp), jnp.float32)], axis=0)
    return w_slab, v_slab


@functools.partial(jax.jit, static_argnames=("batch_tile",))
def attn_mlp_discriminator(x, params, *, batch_tile=None):
    """params: dict with 'wa','ba','hidden' (list of (W,b)), 'wf','bf'.

    Returns (out_d, out_info) matching the PyTorch module's forward (eval mode).
    """
    B, D = x.shape
    hidden_dims = [D] + [w.shape[1] for (w, _b) in params["hidden"]]
    n_hidden = len(params["hidden"])
    last_dim = hidden_dims[-1]

    dp = _round_up(max(D, last_dim + 1), 128)       # lane-dense trunk width
    out_w = _round_up(last_dim + 1, 128)            # lane-dense combined output width

    # Tiling policy (review): even tile sizes, >=2 grid steps (v7x megacore), cap 1024.
    cap = 1024
    if batch_tile is None:
        n_tiles = max(2, pl.cdiv(B, cap))
        tb = _round_up(pl.cdiv(B, n_tiles), 8)
    else:
        tb = max(8, (batch_tile // 8) * 8)
        n_tiles = pl.cdiv(B, tb)
    Bp = n_tiles * tb

    # Zero-pad the batch (benign through the forward: no NaN/Inf), slice off below.
    x_p = jnp.pad(x, ((0, Bp - B), (0, 0))) if Bp != B else x
    w_slab, v_slab = _pack_params(params, input_dim=D, dp=dp, hidden_dims=hidden_dims)

    kernel = _make_kernel(input_dim=D, dp=dp, n_hidden=n_hidden,
                          last_dim=last_dim, out_w=out_w)

    combined = pl.pallas_call(
        kernel,
        grid=(n_tiles,),
        in_specs=[
            pl.BlockSpec((tb, D), lambda i: (i, 0)),            # batch-tiled input
            pl.BlockSpec(w_slab.shape, lambda i: (0, 0)),       # grid-invariant weight slab
            pl.BlockSpec(v_slab.shape, lambda i: (0, 0)),       # grid-invariant bias slab
        ],
        out_specs=pl.BlockSpec((tb, out_w), lambda i: (i, 0)),
        out_shape=jax.ShapeDtypeStruct((Bp, out_w), jnp.float32),
        compiler_params=pltpu.CompilerParams(
            dimension_semantics=("parallel",)),                  # shards tiles on v7x
    )(x_p, w_slab, v_slab)

    out_d = combined[:B, last_dim:last_dim + 1]
    out_info = combined[:B, :last_dim]
    return out_d, out_info


def init_params(key, input_dim: int, num_hid: int):
    """Deterministic synthetic parameter init (shapes follow the PyTorch module)."""
    hidden_dims = _build_hidden_dims(input_dim, num_hid)
    keys = jax.random.split(key, 2 * (len(hidden_dims) + 1))
    ki = iter(range(len(keys)))

    def lin(kw, kb, fan_in, fan_out):
        scale = 1.0 / jnp.sqrt(jnp.float32(fan_in))
        w = jax.random.uniform(kw, (fan_in, fan_out), jnp.float32, -scale, scale)
        b = jax.random.uniform(kb, (1, fan_out), jnp.float32, -scale, scale)
        return w, b

    wa, ba = lin(keys[next(ki)], keys[next(ki)], input_dim, input_dim)
    hidden = []
    for prev, curr in zip(hidden_dims, hidden_dims[1:]):
        hidden.append(lin(keys[next(ki)], keys[next(ki)], prev, curr))
    wf, bf = lin(keys[next(ki)], keys[next(ki)], hidden_dims[-1], 1)
    return {"wa": wa, "ba": ba, "hidden": hidden, "wf": wf, "bf": bf}


def reference_forward(x, params):
    """Pure-JAX f32 reference mirroring the PyTorch forward (eval mode)."""
    attn = jnp.maximum(x @ params["wa"] + params["ba"], 0.0)
    attn = jax.nn.softmax(attn, axis=1)
    h = x * attn
    for w, b in params["hidden"]:
        z = h @ w + b
        h = jnp.where(z >= 0.0, z, 0.2 * z)
    d = jax.nn.sigmoid(h @ params["wf"] + params["bf"])
    return d, h


if __name__ == "__main__":
    INPUT_DIM = 32   # input_dim
    NUM_HID = 3      # num_hid  -> hidden_dims = [32, 16, 8, 4]
    BATCH = 300      # deliberately not a multiple of 8 -> exercises padding path

    key = jax.random.PRNGKey(0)
    kx, kp = jax.random.split(key)
    x = jax.random.normal(kx, (BATCH, INPUT_DIM), dtype=jnp.float32)
    params = init_params(kp, INPUT_DIM, NUM_HID)

    ref_d, ref_info = reference_forward(x, params)
    last_dim = _build_hidden_dims(INPUT_DIM, NUM_HID)[-1]

    # Default tiling (2 even tiles of 152 rows for B=300).
    out_d, out_info = attn_mlp_discriminator(x, params)
    jax.block_until_ready((out_d, out_info))
    assert out_d.shape == (BATCH, 1)
    assert out_info.shape == (BATCH, last_dim)
    # Tolerance covers the bf16 MXU operands; softmax / sigmoid are exact now.
    assert jnp.allclose(out_d, ref_d, atol=2e-2, rtol=2e-2)
    assert jnp.allclose(out_info, ref_info, atol=2e-2, rtol=2e-2)

    # Explicit small tile -> 3-step pipelined batch grid (+ padded tail).
    out_d2, out_info2 = attn_mlp_discriminator(x, params, batch_tile=128)
    jax.block_until_ready((out_d2, out_info2))
    assert jnp.allclose(out_d2, ref_d, atol=2e-2, rtol=2e-2)
    assert jnp.allclose(out_info2, ref_info, atol=2e-2, rtol=2e-2)

    print("KERNEL_OK")
</pallas_src>

<mosaic_0001>
module attributes {stable_mosaic.version = 11 : i64} {
  func.func @kernel(%arg0: i32, %arg1: memref<152x32xf32, #tpu.memory_space<vmem>>, %arg2: memref<512x128xbf16, #tpu.memory_space<vmem>>, %arg3: memref<8x128xf32, #tpu.memory_space<vmem>>, %arg4: memref<152x128xf32, #tpu.memory_space<vmem>>) attributes {dimension_semantics = [#tpu.dimension_semantics<parallel>], iteration_bounds = array<i64: 2>, scalar_prefetch = 0 : i64, scratch_operands = 0 : i64, tpu.core_type = #tpu.core_type<tc>, window_params = [{transform_indices = @transform_0, window_bounds = array<i64: 152, 32>}, {pipeline_mode = #tpu.pipeline_mode<synchronous>, transform_indices = @transform_1, window_bounds = array<i64: 512, 128>}, {pipeline_mode = #tpu.pipeline_mode<synchronous>, transform_indices = @transform_2, window_bounds = array<i64: 8, 128>}, {transform_indices = @transform_3, window_bounds = array<i64: 152, 128>}]} {
    %c0 = arith.constant 0 : index
    %c0_0 = arith.constant 0 : index
    %0 = vector.load %arg1[%c0, %c0_0] : memref<152x32xf32, #tpu.memory_space<vmem>>, vector<152x32xf32>
    %cst = arith.constant 0.000000e+00 : f32
    %1 = vector.broadcast %cst : f32 to vector<152x96xf32>
    %2 = tpu.concatenate %0, %1 in 1 : vector<152x32xf32>, vector<152x96xf32> -> vector<152x128xf32>
    %3 = tpu.iota {dimensions = array<i32: 1>} : vector<152x128xi32>
    %4 = arith.truncf %2 : vector<152x128xf32> to vector<152x128xbf16>
    %c0_1 = arith.constant 0 : index
    %c0_2 = arith.constant 0 : index
    %5 = vector.load %arg2[%c0_1, %c0_2] : memref<512x128xbf16, #tpu.memory_space<vmem>>, vector<128x128xbf16>
    %cst_3 = arith.constant dense<0.000000e+00> : vector<152x128xf32>
    %6 = tpu.matmul %4, %5, %cst_3 {dimension_numbers = #tpu.dot_dimension_numbers<[1], [0], [0], [1], [0, 0, 1, 1], [], []>} : vector<152x128xbf16>, vector<128x128xbf16>, vector<152x128xf32> -> vector<152x128xf32>
    %c0_4 = arith.constant 0 : index
    %c0_5 = arith.constant 0 : index
    %7 = vector.load %arg3[%c0_4, %c0_5] : memref<8x128xf32, #tpu.memory_space<vmem>>, vector<1x128xf32>
    %8 = vector.broadcast %7 : vector<1x128xf32> to vector<152x128xf32>
    %9 = arith.addf %6, %8 : vector<152x128xf32>
    %cst_6 = arith.constant 0.000000e+00 : f32
    %10 = vector.broadcast %cst_6 : f32 to vector<152x128xf32>
    %11 = arith.maximumf %9, %10 : vector<152x128xf32>
    %cst_7 = arith.constant dense<0xFF800000> : vector<152xf32>
    %12 = vector.multi_reduction <maximumf>, %11, %cst_7 [1] : vector<152x128xf32> to vector<152xf32>
    %13 = vector.shape_cast %12 : vector<152xf32> to vector<152x1xf32>
    %c32_i32 = arith.constant 32 : i32
    %14 = vector.broadcast %c32_i32 : i32 to vector<152x128xi32>
    %15 = arith.cmpi slt, %3, %14 : vector<152x128xi32>
    %16 = vector.broadcast %13 : vector<152x1xf32> to vector<152x128xf32>
    %17 = arith.subf %11, %16 : vector<152x128xf32>
    %18 = math.exp %17 : vector<152x128xf32>
    %cst_8 = arith.constant 0.000000e+00 : f32
    %19 = vector.broadcast %cst_8 : f32 to vector<152x128xf32>
    %20 = arith.select %15, %18, %19 : vector<152x128xi1>, vector<152x128xf32>
    %cst_9 = arith.constant dense<0.000000e+00> : vector<152xf32>
    %21 = vector.multi_reduction <add>, %20, %cst_9 [1] : vector<152x128xf32> to vector<152xf32>
    %22 = vector.shape_cast %21 : vector<152xf32> to vector<152x1xf32>
    %23 = vector.broadcast %22 : vector<152x1xf32> to vector<152x128xf32>
    %24 = arith.divf %20, %23 : vector<152x128xf32>
    %25 = arith.mulf %2, %24 : vector<152x128xf32>
    %26 = arith.truncf %25 : vector<152x128xf32> to vector<152x128xbf16>
    %c128 = arith.constant 128 : index
    %c0_10 = arith.constant 0 : index
    %27 = vector.load %arg2[%c128, %c0_10] : memref<512x128xbf16, #tpu.memory_space<vmem>>, vector<128x128xbf16>
    %cst_11 = arith.constant dense<0.000000e+00> : vector<152x128xf32>
    %28 = tpu.matmul %26, %27, %cst_11 {dimension_numbers = #tpu.dot_dimension_numbers<[1], [0], [0], [1], [0, 0, 1, 1], [], []>} : vector<152x128xbf16>, vector<128x128xbf16>, vector<152x128xf32> -> vector<152x128xf32>
    %c1 = arith.constant 1 : index
    %c0_12 = arith.constant 0 : index
    %29 = vector.load %arg3[%c1, %c0_12] : memref<8x128xf32, #tpu.memory_space<vmem>>, vector<1x128xf32>
    %30 = vector.broadcast %29 : vector<1x128xf32> to vector<152x128xf32>
    %31 = arith.addf %28, %30 : vector<152x128xf32>
    %cst_13 = arith.constant 2.000000e-01 : f32
    %32 = vector.broadcast %cst_13 : f32 to vector<152x128xf32>
    %33 = arith.mulf %32, %31 : vector<152x128xf32>
    %34 = arith.maximumf %31, %33 : vector<152x128xf32>
    %35 = arith.truncf %34 : vector<152x128xf32> to vector<152x128xbf16>
    %c256 = arith.constant 256 : index
    %c0_14 = arith.constant 0 : index
    %36 = vector.load %arg2[%c256, %c0_14] : memref<512x128xbf16, #tpu.memory_space<vmem>>, vector<128x128xbf16>
    %cst_15 = arith.constant dense<0.000000e+00> : vector<152x128xf32>
    %37 = tpu.matmul %35, %36, %cst_15 {dimension_numbers = #tpu.dot_dimension_numbers<[1], [0], [0], [1], [0, 0, 1, 1], [], []>} : vector<152x128xbf16>, vector<128x128xbf16>, vector<152x128xf32> -> vector<152x128xf32>
    %c2 = arith.constant 2 : index
    %c0_16 = arith.constant 0 : index
    %38 = vector.load %arg3[%c2, %c0_16] : memref<8x128xf32, #tpu.memory_space<vmem>>, vector<1x128xf32>
    %39 = vector.broadcast %38 : vector<1x128xf32> to vector<152x128xf32>
    %40 = arith.addf %37, %39 : vector<152x128xf32>
    %cst_17 = arith.constant 2.000000e-01 : f32
    %41 = vector.broadcast %cst_17 : f32 to vector<152x128xf32>
    %42 = arith.mulf %41, %40 : vector<152x128xf32>
    %43 = arith.maximumf %40, %42 : vector<152x128xf32>
    %44 = arith.truncf %43 : vector<152x128xf32> to vector<152x128xbf16>
    %c384 = arith.constant 384 : index
    %c0_18 = arith.constant 0 : index
    %45 = vector.load %arg2[%c384, %c0_18] : memref<512x128xbf16, #tpu.memory_space<vmem>>, vector<128x128xbf16>
    %cst_19 = arith.constant dense<0.000000e+00> : vector<152x128xf32>
    %46 = tpu.matmul %44, %45, %cst_19 {dimension_numbers = #tpu.dot_dimension_numbers<[1], [0], [0], [1], [0, 0, 1, 1], [], []>} : vector<152x128xbf16>, vector<128x128xbf16>, vector<152x128xf32> -> vector<152x128xf32>
    %c3 = arith.constant 3 : index
    %c0_20 = arith.constant 0 : index
    %47 = vector.load %arg3[%c3, %c0_20] : memref<8x128xf32, #tpu.memory_space<vmem>>, vector<1x128xf32>
    %48 = vector.broadcast %47 : vector<1x128xf32> to vector<152x128xf32>
    %49 = arith.addf %46, %48 : vector<152x128xf32>
    %cst_21 = arith.constant 2.000000e-01 : f32
    %50 = vector.broadcast %cst_21 : f32 to vector<152x128xf32>
    %51 = arith.mulf %50, %49 : vector<152x128xf32>
    %52 = arith.maximumf %49, %51 : vector<152x128xf32>
    %c4 = arith.constant 4 : index
    %c0_22 = arith.constant 0 : index
    %53 = vector.load %arg3[%c4, %c0_22] : memref<8x128xf32, #tpu.memory_space<vmem>>, vector<1x128xf32>
    %c5 = arith.constant 5 : index
    %c0_23 = arith.constant 0 : index
    %54 = vector.load %arg3[%c5, %c0_23] : memref<8x128xf32, #tpu.memory_space<vmem>>, vector<1x128xf32>
    %55 = vector.broadcast %53 : vector<1x128xf32> to vector<152x128xf32>
    %56 = arith.mulf %52, %55 : vector<152x128xf32>
    %cst_24 = arith.constant dense<0.000000e+00> : vector<152xf32>
    %57 = vector.multi_reduction <add>, %56, %cst_24 [1] : vector<152x128xf32> to vector<152xf32>
    %58 = vector.shape_cast %57 : vector<152xf32> to vector<152x1xf32>
    %59 = vector.extract_strided_slice %54 {offsets = [0, 0], sizes = [1, 1], strides = [1, 1]} : vector<1x128xf32> to vector<1x1xf32>
    %60 = vector.broadcast %59 : vector<1x1xf32> to vector<152x1xf32>
    %61 = arith.addf %58, %60 : vector<152x1xf32>
    %cst_25 = arith.constant 0.000000e+00 : f32
    %62 = vector.broadcast %cst_25 : f32 to vector<152x1xf32>
    %63 = arith.subf %62, %61 : vector<152x1xf32>
    %64 = math.exp %63 : vector<152x1xf32>
    %cst_26 = arith.constant 1.000000e+00 : f32
    %65 = vector.broadcast %cst_26 : f32 to vector<152x1xf32>
    %66 = arith.addf %65, %64 : vector<152x1xf32>
    %cst_27 = arith.constant 1.000000e+00 : f32
    %67 = vector.broadcast %cst_27 : f32 to vector<152x1xf32>
    %68 = arith.divf %67, %66 : vector<152x1xf32>
    %c4_i32 = arith.constant 4 : i32
    %69 = vector.broadcast %c4_i32 : i32 to vector<152x128xi32>
    %70 = arith.cmpi eq, %3, %69 : vector<152x128xi32>
    %71 = vector.shape_cast %68 : vector<152x1xf32> to vector<152x1xf32>
    %72 = vector.broadcast %71 : vector<152x1xf32> to vector<152x128xf32>
    %73 = arith.select %70, %72, %52 : vector<152x128xi1>, vector<152x128xf32>
    %c0_28 = arith.constant 0 : index
    %c0_29 = arith.constant 0 : index
    %74 = vector.load %arg4[%c0_28, %c0_29] : memref<152x128xf32, #tpu.memory_space<vmem>>, vector<152x128xf32>
    tpu.vector_store %arg4[%c0_28, %c0_29], %73 {strides = array<i32>} : memref<152x128xf32, #tpu.memory_space<vmem>>, vector<152x128xf32>,
    return
  }
  func.func @transform_0(%arg0: i32) -> (i32, i32) {
    %c0_i32 = arith.constant 0 : i32
    %c0_i32_0 = arith.constant 0 : i32
    return %arg0, %c0_i32 : i32, i32
  }
  func.func @transform_1(%arg0: i32) -> (i32, i32) {
    %c0_i32 = arith.constant 0 : i32
    %c0_i32_0 = arith.constant 0 : i32
    %c0_i32_1 = arith.constant 0 : i32
    return %c0_i32, %c0_i32_0 : i32, i32
  }
  func.func @transform_2(%arg0: i32) -> (i32, i32) {
    %c0_i32 = arith.constant 0 : i32
    %c0_i32_0 = arith.constant 0 : i32
    %c0_i32_1 = arith.constant 0 : i32
    return %c0_i32, %c0_i32_0 : i32, i32
  }
  func.func @transform_3(%arg0: i32) -> (i32, i32) {
    %c0_i32 = arith.constant 0 : i32
    %c0_i32_0 = arith.constant 0 : i32
    return %arg0, %c0_i32 : i32, i32
  }
}

</mosaic_0001>

<bundles_post_ra>
// kernel: attn_mlp_discriminator.1
= control target key start
LH: loop header
LB: loop body
LE: loop exit
PB: predicated region body
PF: predicated region fallthrough
CT: control target
= control target key end

     0   :  { %s2230_s12 = smov 0   ;;  %s3023_s0 = inlined_call_operand.vmem [shape: f32[304,32], index: 0, kind: input, shape index: {}]   ;;  %s3024_s1 = inlined_call_operand.vmem [shape: bf16[512,128], index: 1, kind: input, shape index: {}]   ;;  %s3025_s2 = inlined_call_operand.vmem [shape: f32[8,128], index: 2, kind: input, shape index: {}]   ;;  %s3026_s3 = inlined_call_operand.vmem [shape: f32[304,128], index: 3, kind: output, shape index: {}]  }
   0x1 LB: > { %s1713_s13 = sadd.s32 4294967295, %s2207_s12   ;;  %p1717_p0 = scmp.ge.s32.totalorder %s2207_s12, 1  ;;  %s2207_s12 = sphi %s2230_s12, %s13_s12  }
   0x2   : > { %p138_p1 = scmp.lt.s32.totalorder %s2207_s12, 3 }
   0x4   : > { %p139_p2 = pnand %p1717_p0, %p138_p1 }
   0x5   : > { %v2017_v0 = vld [vmem:[%s3024_s1] sm:$0xff] (!%p139_p2)   ;;  %s162_s16 = smul.u32 (!%p139_p2), 19, %s1713_s13  ;;  %v2018_v1 = vld [vmem:[%s3024_s1 + $0x8] sm:$0xff] (!%p139_p2)   ;;  %v2019_v2 = vld [vmem:[%s3024_s1 + $0x10] sm:$0xff] (!%p139_p2)   ;;  %vm194_vm0 = vcmask (!%p139_p2), 261120  }
   0x6   : > { %142 = sbr.rel (%p139_p2) target bundleno = 1599 (0x63f), region = 32  ;;  %1862 = vmatprep.subr.bf16.mxu0 (!%p139_p2), %v2017_v0  ;;  %v2020_v3 = vld [vmem:[%s3024_s1 + $0x18] sm:$0xff] (!%p139_p2)   ;;  %vm2268_vm1 = vmpackc.low (!%p139_p2), %vm194_vm0, %vm194_vm0  ;;  %v2021_v8 = vld [vmem:[%s3024_s1 + $0x20] sm:$0xff] (!%p139_p2)  }
   0x7   : > { %p163_p3 = scmp.lt.s32.totalorder (!%p139_p2), %s162_s16, 37  ;;  %1863 = vmatpush3.bf16.msra.mxu0 (!%p139_p2), %v2017_v0  ;;  %v2022_v9 = vld [vmem:[%s3024_s1 + $0x28] sm:$0xff] (!%p139_p2)   ;;  %v2023_v10 = vld [vmem:[%s3024_s1 + $0x30] sm:$0xff] (!%p139_p2)   ;;  %v2024_v11 = vld [vmem:[%s3024_s1 + $0x38] sm:$0xff] (!%p139_p2)  }
   0x8   : > { %1864 = vmatprep.subr.bf16.mxu0 (!%p139_p2), %v2018_v1  ;;  %v2378_v38 = vld [vmem:[%s3025_s2] ss:$0 sm:$0xff] (!%p139_p2) }
   0xb   : > { %1865 = vmatpush3.bf16.msra.mxu0 (!%p139_p2), %v2018_v1 }
   0xc   : > { %1866 = vmatprep.subr.bf16.mxu0 (!%p139_p2), %v2019_v2 }
   0xd   : > { %s3040_s16 = smov (!%p163_p3, %s162_s16), 37 }
   0xe   : > { %s1718_s21 = sshll.u32 %s3040_s16, 3 }
   0xf   : > { %s2258_s26 = scalar_lea.vmem %s3023_s0, %s1718_s21  ;;  %1867 = vmatpush3.bf16.msra.mxu0 %v2019_v2  ;;  %s2942_s25 = scalar_lea.vmem %s3026_s3, %s1718_s21 }
  0x10   : > { %v2261_v4 = vld [vmem:[%s2258_s26] sm:$0xff]  ;;  %v2264_v5 = vld [vmem:[%s2258_s26 + $0x8] sm:$0xff]  ;;  %1868 = vmatprep.subr.bf16.mxu0 %v2020_v3  ;;  %v2289_v12 = vld [vmem:[%s2258_s26 + $0x10] sm:$0xff] }
  0x11   : > { %v1730_v7 = vpack.c.bf16 %v2264_v5, %v2261_v4  ;;  %v2292_v13 = vld [vmem:[%s2258_s26 + $0x18] sm:$0xff]  ;;  %v2295_v14 = vld [vmem:[%s2258_s26 + $0x20] sm:$0xff]  ;;  %v2298_v15 = vld [vmem:[%s2258_s26 + $0x28] sm:$0xff] }
  0x12   : > { %v1733_v16 = vpack.c.bf16 %v2292_v13, %v2289_v12  ;;  %v1736_v17 = vpack.c.bf16 %v2298_v15, %v2295_v14  ;;  %v2309_v18 = vld [vmem:[%s2258_s26 + $0x30] sm:$0xff]  ;;  %v2312_v19 = vld [vmem:[%s2258_s26 + $0x38] sm:$0xff]  ;;  %v2315_v20 = vld [vmem:[%s2258_s26 + $0x40] sm:$0xff] }
  0x13   : > { %1878 = vmatprep.mubr.msk.bf16.mxu0 %vm2268_vm1, %v1730_v7  ;;  %1869 = vmatpush3.bf16.msra.mxu0 %v2020_v3  ;;  %v2318_v21 = vld [vmem:[%s2258_s26 + $0x48] sm:$0xff]  ;;  %v1739_v22 = vpack.c.bf16 %v2312_v19, %v2309_v18  ;;  %v2329_v24 = vld [vmem:[%s2258_s26 + $0x50] sm:$0xff]  ;;  %v2332_v25 = vld [vmem:[%s2258_s26 + $0x58] sm:$0xff] }
  0x14   : > { %1870 = vmatprep.subr.bf16.mxu0 %v2021_v8  ;;  %v1742_v23 = vpack.c.bf16 %v2318_v21, %v2315_v20  ;;  %v2335_v26 = vld [vmem:[%s2258_s26 + $0x60] sm:$0xff]  ;;  %v2338_v27 = vld [vmem:[%s2258_s26 + $0x68] sm:$0xff]  ;;  %v1745_v28 = vpack.c.bf16 %v2332_v25, %v2329_v24  ;;  %v2349_v30 = vld [vmem:[%s2258_s26 + $0x70] sm:$0xff] }
  0x15   : > { %v1748_v29 = vpack.c.bf16 %v2338_v27, %v2335_v26  ;;  %v2352_v31 = vld [vmem:[%s2258_s26 + $0x78] sm:$0xff]  ;;  %v2355_v32 = vld [vmem:[%s2258_s26 + $0x80] sm:$0xff]  ;;  %v2358_v33 = vld [vmem:[%s2258_s26 + $0x88] sm:$0xff] }
  0x16   : > { %v1751_v34 = vpack.c.bf16 %v2352_v31, %v2349_v30  ;;  %v1754_v35 = vpack.c.bf16 %v2358_v33, %v2355_v32  ;;  %v2369_v36 = vld [vmem:[%s2258_s26 + $0x90] sm:$0xff] }
  0x17   : > { %1871 = vmatpush3.bf16.msra.mxu0 %v2021_v8  ;;  %v1757_v37 = vpack.c.bf16 %v2369_v36, %v2369_v36 }
  0x18   : > { %1872 = vmatprep.subr.bf16.mxu0 %v2022_v9 }
  0x1b   : > { %1873 = vmatpush3.bf16.msra.mxu0 %v2022_v9 }
  0x1c   : > { %1874 = vmatprep.subr.bf16.mxu0 %v2023_v10 }
  0x1f   : > { %1875 = vmatpush3.bf16.msra.mxu0 %v2023_v10 }
  0x20   : > { %1876 = vmatprep.subr.bf16.mxu0 %v2024_v11 }
  0x23   : > { %1877 = vmatpush3.bf16.msra.mxu0 %v2024_v11 }
  0x26   : > { %1879 = vmatmul.mubr.msk.bf16.vlgmr.msra.gmra.mrb[0].mxu0 %vm2268_vm1, %v1733_v16 }
  0x27   : > { %1882 = vmatprep.mubr.msk.bf16.mxu0 %vm2268_vm1, %v1736_v17 }
  0x2e   : > { %1883 = vmatmul.mubr.msk.bf16.gmra.mrb[4].mxu0 %vm2268_vm1, %v1739_v22 }
  0x2f   : > { %1886 = vmatprep.mubr.msk.bf16.mxu0 %vm2268_vm1, %v1742_v23 }
  0x36   : > { %1887 = vmatmul.mubr.msk.bf16.gmra.mrb[8].mxu0 %vm2268_vm1, %v1745_v28 }
  0x37   : > { %1890 = vmatprep.mubr.msk.bf16.mxu0 %vm2268_vm1, %v1748_v29 }
  0x3e   : > { %1891 = vmatmul.mubr.msk.bf16.gmra.mrb[12].mxu0 %vm2268_vm1, %v1751_v34 }
  0x3f   : > { %1894 = vmatprep.mubr.msk.bf16.mxu0 %vm2268_vm1, %v1754_v35 }
  0x46   : > { %1895 = vmatmul.mubr.msk.bf16.gmra.mrb[16].mxu0 %vm2268_vm1, %v1757_v37 }
  0xf9   : > { %v1880_v39 = vpop.f32.mrb[0].mxu0 }
  0xfa   : > { %v2381_v40 = vadd.f32 %v1880_v39, %v2378_v38  ;;  %v329_v41 = vpop.f32.mrb[1].mxu0 }
  0xfb   : > { %v2384_v42 = vadd.f32 %v2378_v38, %v329_v41  ;;  %v1881_v43 = vpop.f32.mrb[2].mxu0 }
  0xfc   : > { %v409_v44 = vmax.f32 %v2381_v40, 0.0  ;;  %v2388_v45 = vadd.f32 %v1881_v43, %v2378_v38  ;;  %v332_v46 = vpop.f32.mrb[3].mxu0 }
  0xfd   : > { %v407_v47 = vmax.f32 %v2384_v42, 0.0  ;;  %v2392_v48 = vadd.f32 %v2378_v38, %v332_v46 }
  0xfe   : > { %430 = vmax.xlane.f32.xlu1 %v409_v44  ;;  %v410_v49 = vmax.f32 %v2388_v45, 0.0 }
  0xff   : > { %426 = vmax.xlane.f32.xlu0 %v407_v47  ;;  %v408_v50 = vmax.f32 %v2392_v48, 0.0 }
 0x101   : > { %v1884_v51 = vpop.f32.mrb[4].mxu0 }
 0x102   : > { %432 = vmax.xlane.f32.xlu1 %v410_v49  ;;  %v345_v52 = vpop.f32.mrb[5].mxu0  ;;  %v2403_v53 = vadd.f32 %v1884_v51, %v2378_v38 }
 0x103   : > { %v2406_v54 = vadd.f32 %v2378_v38, %v345_v52  ;;  %v1885_v55 = vpop.f32.mrb[6].mxu0  ;;  %428 = vmax.xlane.f32.xlu0 %v408_v50 }
 0x104   : > { %v348_v56 = vpop.f32.mrb[7].mxu0  ;;  %v2412_v58 = vadd.f32 %v1885_v55, %v2378_v38  ;;  %v413_v60 = vmax.f32 %v2403_v53, 0.0 }
 0x105   : > { %v411_v57 = vmax.f32 %v2406_v54, 0.0  ;;  %v2415_v59 = vadd.f32 %v2378_v38, %v348_v56 }
 0x106   : > { %v414_v62 = vmax.f32 %v2412_v58, 0.0 }
 0x107   : > { %v412_v61 = vmax.f32 %v2415_v59, 0.0  ;;  %434 = vmax.xlane.f32.xlu0 %v411_v57 }
 0x109   : > { %v1888_v63 = vpop.f32.mrb[8].mxu0  ;;  %436 = vmax.xlane.f32.xlu1 %v412_v61 }
 0x10a   : > { %v361_v0 = vpop.f32.mrb[9].mxu0  ;;  %v2425_v1 = vadd.f32 %v1888_v63, %v2378_v38 }
 0x10b   : > { %v2428_v2 = vadd.f32 %v2378_v38, %v361_v0  ;;  %v1889_v3 = vpop.f32.mrb[10].mxu0  ;;  %438 = vmax.xlane.f32.xlu0 %v413_v60 }
 0x10c   : > { %v364_v6 = vpop.f32.mrb[11].mxu0  ;;  %v2434_v8 = vadd.f32 %v1889_v3, %v2378_v38  ;;  %v417_v10 = vmax.f32 %v2425_v1, 0.0 }
 0x10d   : > { %v415_v7 = vmax.f32 %v2428_v2, 0.0  ;;  %v2437_v9 = vadd.f32 %v2378_v38, %v364_v6  ;;  %440 = vmax.xlane.f32.xlu1 %v414_v62 }
 0x10e   : > { %v418_v16 = vmax.f32 %v2434_v8, 0.0 }
 0x10f   : > { %v416_v11 = vmax.f32 %v2437_v9, 0.0  ;;  %442 = vmax.xlane.f32.xlu0 %v415_v7 }
 0x111   : > { %v1892_v17 = vpop.f32.mrb[12].mxu0  ;;  %444 = vmax.xlane.f32.xlu1 %v416_v11 }
 0x112   : > { %v377_v22 = vpop.f32.mrb[13].mxu0  ;;  %v2449_v23 = vadd.f32 %v1892_v17, %v2378_v38 }
 0x113   : > { %v2452_v28 = vadd.f32 %v2378_v38, %v377_v22  ;;  %v1893_v29 = vpop.f32.mrb[14].mxu0  ;;  %446 = vmax.xlane.f32.xlu0 %v417_v10 }
 0x114   : > { %v380_v34 = vpop.f32.mrb[15].mxu0  ;;  %v2458_v37 = vadd.f32 %v1893_v29, %v2378_v38  ;;  %v3031_v41 = vmax.f32 %v2449_v23, 0.0  ;;  %v2026_v29 = vld [vmem:[%s3024_s1 + $0x48] sm:$0xff]  }
 0x115   : > { %v419_v35 = vmax.f32 %v2452_v28, 0.0  ;;  %v2461_v39 = vadd.f32 %v2378_v38, %v380_v34  ;;  %448 = vmax.xlane.f32.xlu1 %v418_v16 }
 0x116   : > { %v3030_v46 = vmax.f32 %v2458_v37, 0.0 }
 0x117   : > { %v420_v43 = vmax.f32 %v2461_v39, 0.0  ;;  %450 = vmax.xlane.f32.xlu0 %v419_v35 }
 0x119   : > { %v1896_v51 = vpop.f32.mrb[16].mxu0  ;;  %452 = vmax.xlane.f32.xlu1 %v420_v43 }
 0x11a   : > { %v393_v52 = vpop.f32.mrb[17].mxu0  ;;  %v2473_v55 = vadd.f32 %v1896_v51, %v2378_v38 }
 0x11b   : > { %v2476_v56 = vadd.f32 %v2378_v38, %v393_v52  ;;  %v1897_v63 = vpop.f32.mrb[18].mxu0  ;;  %454 = vmax.xlane.f32.xlu0 %v3031_v41 }
 0x11c   : > { %v396_v0 = vpop.f32.mrb[19].mxu0  ;;  %v3027_v17 = vmax.f32 %v2473_v55, 0.0 }
 0x11d   : > { %v3029_v3 = vmax.f32 %v2476_v56, 0.0  ;;  %v2482_v6 = vadd.f32 %v2378_v38, %v396_v0  ;;  %456 = vmax.xlane.f32.xlu1 %v3030_v46  ;;  %v2025_v38 = vld [vmem:[%s3024_s1 + $0x40] sm:$0xff]  }
 0x11e   : > { %1898 = vmatprep.subr.bf16.mxu1 %v2025_v38 }
 0x11f   : > { %v3028_v22 = vmax.f32 %v2482_v6, 0.0  ;;  %458 = vmax.xlane.f32.xlu0 %v3029_v3  ;;  %1899 = vmatpush3.bf16.msra.mxu1 %v2025_v38 }
 0x120   : > { %1900 = vmatprep.subr.bf16.mxu1 %v2026_v29 }
 0x121   : > { %460 = vmax.xlane.f32.xlu1 %v3028_v22 }
 0x123   : > { %462 = vmax.xlane.f32.xlu0 %v3027_v17  ;;  %1901 = vmatpush3.bf16.msra.mxu1 %v2026_v29  ;;  %v214_v29 = vlaneseq }
 0x18b   : > { %v431_v34 = vpop.xlane.xlu1 %430 }
 0x18c   : > { %v467_v51 = vsub.f32 %v409_v44, %v431_v34  ;;  %v427_v52 = vpop.xlane.xlu0 %426 }
 0x18d   : > { %v465_v63 = vsub.f32 %v407_v47, %v427_v52  ;;  %v2510_v47 = vand.u32 127, %v214_v29 }
 0x18e   : > { %v488_v0 = vmul.f32 1.442695, %v467_v51 }
 0x18f   : > { %v484_v17 = vmul.f32 1.442695, %v465_v63  ;;  %v433_v22 = vpop.xlane.xlu1 %432  ;;  %vm464_vm2 = vcmp.lt.s32.totalorder %v2510_v47, 32  ;;  %vm1523_vm3 = vcmp.eq.s32.totalorder %v2510_v47, 4 }
 0x190   : > { %v468_v3 = vsub.f32 %v410_v49, %v433_v22  ;;  %v429_v46 = vpop.xlane.xlu0 %428 }
 0x191   : > { %2049 = vpow2.f32 %v484_v17  ;;  %v466_v38 = vsub.f32 %v408_v50, %v429_v46 }
 0x192   : > { %2051 = vpow2.f32 %v488_v0  ;;  %v490_v41 = vmul.f32 1.442695, %v468_v3 }
 0x193   : > { %v486_v40 = vmul.f32 1.442695, %v466_v38 }
 0x194   : > { %v435_v44 = vpop.xlane.xlu0 %434 }
 0x195   : > { %2053 = vpow2.f32 %v486_v40  ;;  %v469_v42 = vsub.f32 %v411_v57, %v435_v44 }
 0x196   : > { %v437_v34 = vpop.xlane.xlu1 %436  ;;  %2055 = vpow2.f32 %v490_v41 }
 0x197   : > { %v492_v45 = vmul.f32 1.442695, %v469_v42  ;;  %v470_v49 = vsub.f32 %v412_v61, %v437_v34 }
 0x198   : > { %v439_v17 = vpop.xlane.xlu0 %438 }
 0x199   : > { %2057 = vpow2.f32 %v492_v45  ;;  %v494_v48 = vmul.f32 1.442695, %v470_v49  ;;  %v471_v50 = vsub.f32 %v413_v60, %v439_v17 }
 0x19a   : > { %v441_v46 = vpop.xlane.xlu1 %440 }
 0x19b   : > { %v2050_v3 = vpop.eup %2049  ;;  %2059 = vpow2.f32 %v494_v48  ;;  %v496_v54 = vmul.f32 1.442695, %v471_v50  ;;  %v472_v57 = vsub.f32 %v414_v62, %v441_v46 }
 0x19c   : > { %v443_v41 = vpop.xlane.xlu0 %442  ;;  %v2521_v59 = vsel %vm464_vm2, %v2050_v3, 0.0  ;;  %v2052_v61 = vpop.eup %2051  ;;  %v3034_v3 = vmax.f32 %v2449_v23, 0.0 }
 0x19d   : > { %2061 = vpow2.f32 %v496_v54  ;;  %v498_v22 = vmul.f32 1.442695, %v472_v57  ;;  %v473_v53 = vsub.f32 %v415_v7, %v443_v41  ;;  %541 = vadd.xlane.f32.xlu1 %v2521_v59  ;;  %v2530_v63 = vsel %vm464_vm2, %v2052_v61, 0.0 }
 0x19e   : > { %v445_v60 = vpop.xlane.xlu1 %444  ;;  %v3035_v61 = vmax.f32 %v2458_v37, 0.0 }
 0x19f   : > { %v2054_v51 = vpop.eup %2053  ;;  %2063 = vpow2.f32 %v498_v22  ;;  %v500_v52 = vmul.f32 1.442695, %v473_v53  ;;  %v474_v58 = vsub.f32 %v416_v11, %v445_v60 }
 0x1a0   : > { %v447_v62 = vpop.xlane.xlu0 %446  ;;  %v2534_v0 = vsel %vm464_vm2, %v2054_v51, 0.0  ;;  %v2056_v2 = vpop.eup %2055 }
 0x1a1   : > { %2065 = vpow2.f32 %v500_v52  ;;  %v502_v7 = vmul.f32 1.442695, %v474_v58  ;;  %v475_v38 = vsub.f32 %v417_v10, %v447_v62  ;;  %545 = vadd.xlane.f32.xlu1 %v2530_v63  ;;  %543 = vadd.xlane.f32.xlu0 %v2534_v0  ;;  %v2544_v42 = vsel %vm464_vm2, %v2056_v2, 0.0 }
 0x1a2   : > { %v449_v9 = vpop.xlane.xlu1 %448  ;;  %v3036_v58 = vmax.f32 %v2476_v56, 0.0 }
 0x1a3   : > { %v2058_v11 = vpop.eup %2057  ;;  %2067 = vpow2.f32 %v502_v7  ;;  %v504_v29 = vmul.f32 1.442695, %v475_v38  ;;  %v476_v40 = vsub.f32 %v418_v16, %v449_v9  ;;  %v3037_v38 = vmax.f32 %v2482_v6, 0.0 }
 0x1a4   : > { %v451_v44 = vpop.xlane.xlu0 %450  ;;  %v2548_v1 = vsel %vm464_vm2, %v2058_v11, 0.0  ;;  %v2028_v11 = vld [vmem:[%s3024_s1 + $0x58] sm:$0xff]  }
 0x1a5   : > { %v2060_v10 = vpop.eup %2059  ;;  %2069 = vpow2.f32 %v504_v29  ;;  %v506_v34 = vmul.f32 1.442695, %v476_v40  ;;  %v477_v45 = vsub.f32 %v419_v35, %v451_v44  ;;  %547 = vadd.xlane.f32.xlu0 %v2544_v42  ;;  %549 = vadd.xlane.f32.xlu1 %v2548_v1 }
 0x1a6   : > { %v453_v8 = vpop.xlane.xlu1 %452  ;;  %v2558_v50 = vsel %vm464_vm2, %v2060_v10, 0.0 }
 0x1a7   : > { %v2062_v16 = vpop.eup %2061  ;;  %2071 = vpow2.f32 %v506_v34  ;;  %v508_v49 = vmul.f32 1.442695, %v477_v45  ;;  %v478_v17 = vsub.f32 %v420_v43, %v453_v8  ;;  %v2027_v43 = vld [vmem:[%s3024_s1 + $0x50] sm:$0xff]   ;;  %v3038_v34 = vmax.f32 %v2473_v55, 0.0 }
 0x1a8   : > { %v455_v48 = vpop.xlane.xlu0 %454  ;;  %v2562_v28 = vsel %vm464_vm2, %v2062_v16, 0.0  ;;  %1902 = vmatprep.subr.bf16.mxu1 %v2027_v43  ;;  %v2029_v16 = vld [vmem:[%s3024_s1 + $0x60] sm:$0xff]  }
 0x1a9   : > { %v2064_v35 = vpop.eup %2063  ;;  %2073 = vpow2.f32 %v508_v49  ;;  %v510_v46 = vmul.f32 1.442695, %v478_v17  ;;  %v479_v54 = vsub.f32 %v3034_v3, %v455_v48  ;;  %551 = vadd.xlane.f32.xlu0 %v2558_v50  ;;  %553 = vadd.xlane.f32.xlu1 %v2562_v28 }
 0x1aa   : > { %v457_v39 = vpop.xlane.xlu1 %456  ;;  %v2575_v23 = vsel %vm464_vm2, %v2064_v35, 0.0  ;;  %1903 = vmatpush3.bf16.msra.mxu1 %v2027_v43  ;;  %v2030_v35 = vld [vmem:[%s3024_s1 + $0x68] sm:$0xff]   ;;  %v2031_v43 = vld [vmem:[%s3024_s1 + $0x70] sm:$0xff]  }
 0x1ab   : > { %v2066_v57 = vpop.eup %2065  ;;  %2075 = vpow2.f32 %v510_v46  ;;  %v512_v41 = vmul.f32 1.442695, %v479_v54  ;;  %v480_v22 = vsub.f32 %v3035_v61, %v457_v39  ;;  %1904 = vmatprep.subr.bf16.mxu1 %v2028_v11 }
 0x1ac   : > { %v459_v53 = vpop.xlane.xlu0 %458  ;;  %v2579_v60 = vsel %vm464_vm2, %v2066_v57, 0.0 }
 0x1ad   : > { %v2068_v51 = vpop.eup %2067  ;;  %2077 = vpow2.f32 %v512_v41  ;;  %v514_v52 = vmul.f32 1.442695, %v480_v22  ;;  %v481_v62 = vsub.f32 %v3036_v58, %v459_v53  ;;  %555 = vadd.xlane.f32.xlu0 %v2575_v23  ;;  %557 = vadd.xlane.f32.xlu1 %v2579_v60  ;;  %v2032_v53 = vld [vmem:[%s3024_s1 + $0x78] sm:$0xff]   ;;  %v2033_v58 = vld [vmem:[%s3024_s1 + $0x80] sm:$0xff]  }
 0x1ae   : > { %v461_v37 = vpop.xlane.xlu1 %460  ;;  %v2592_v56 = vsel %vm464_vm2, %v2068_v51, 0.0  ;;  %1905 = vmatpush3.bf16.msra.mxu1 %v2028_v11  ;;  %1934 = vmatprep.subr.bf16.mxu0 %v2033_v58 }
 0x1af   : > { %v2070_v2 = vpop.eup %2069  ;;  %2079 = vpow2.f32 %v514_v52  ;;  %v516_v7 = vmul.f32 1.442695, %v481_v62  ;;  %v482_v9 = vsub.f32 %v3037_v38, %v461_v37  ;;  %1906 = vmatprep.subr.bf16.mxu1 %v2029_v16  ;;  %v2034_v62 = vld [vmem:[%s3024_s1 + $0x88] sm:$0xff]   ;;  %1935 = vmatpush3.bf16.msra.mxu0 %v2033_v58  ;;  %v2035_v37 = vld [vmem:[%s3024_s1 + $0x90] sm:$0xff]  }
 0x1b0   : > { %v463_v29 = vpop.xlane.xlu0 %462  ;;  %v2596_v40 = vsel %vm464_vm2, %v2070_v2, 0.0  ;;  %1936 = vmatprep.subr.bf16.mxu0 %v2034_v62  ;;  %v2036_v2 = vld [vmem:[%s3024_s1 + $0x98] sm:$0xff]   ;;  %v2038_v38 = vld [vmem:[%s3024_s1 + $0xa8] sm:$0xff]  }
 0x1b1   : > { %v2072_v44 = vpop.eup %2071  ;;  %2081 = vpow2.f32 %v516_v7  ;;  %v518_v10 = vmul.f32 1.442695, %v482_v9  ;;  %v483_v6 = vsub.f32 %v3038_v34, %v463_v29  ;;  %559 = vadd.xlane.f32.xlu0 %v2592_v56  ;;  %561 = vadd.xlane.f32.xlu1 %v2596_v40  ;;  %v2037_v7 = vld [vmem:[%s3024_s1 + $0xa0] sm:$0xff]  }
 0x1b2   : > { %v2607_v49 = vsel %vm464_vm2, %v2072_v44, 0.0  ;;  %1907 = vmatpush3.bf16.msra.mxu1 %v2029_v16 }
 0x1b3   : > { %v2074_v45 = vpop.eup %2073  ;;  %2083 = vpow2.f32 %v518_v10  ;;  %v520_v8 = vmul.f32 1.442695, %v483_v6  ;;  %1908 = vmatprep.subr.bf16.mxu1 %v2030_v35  ;;  %1937 = vmatpush3.bf16.msra.mxu0 %v2034_v62 }
 0x1b4   : > { %v2611_v55 = vsel %vm464_vm2, %v2074_v45, 0.0  ;;  %1938 = vmatprep.subr.bf16.mxu0 %v2035_v37 }
 0x1b5   : > { %v2076_v17 = vpop.eup %2075  ;;  %2085 = vpow2.f32 %v520_v8  ;;  %563 = vadd.xlane.f32.xlu0 %v2607_v49  ;;  %565 = vadd.xlane.f32.xlu1 %v2611_v55 }
 0x1b6   : > { %v2620_v46 = vsel %vm464_vm2, %v2076_v17, 0.0  ;;  %1909 = vmatpush3.bf16.msra.mxu1 %v2030_v35 }
 0x1b7   : > { %v2078_v48 = vpop.eup %2077  ;;  %1910 = vmatprep.subr.bf16.mxu1 %v2031_v43  ;;  %1939 = vmatpush3.bf16.msra.mxu0 %v2035_v37 }
 0x1b8   : > { %v2624_v3 = vsel %vm464_vm2, %v2078_v48, 0.0  ;;  %1940 = vmatprep.subr.bf16.mxu0 %v2036_v2 }
 0x1b9   : > { %v2080_v54 = vpop.eup %2079  ;;  %567 = vadd.xlane.f32.xlu0 %v2620_v46  ;;  %569 = vadd.xlane.f32.xlu1 %v2624_v3 }
 0x1ba   : > { %v2633_v57 = vsel %vm464_vm2, %v2080_v54, 0.0  ;;  %1911 = vmatpush3.bf16.msra.mxu1 %v2031_v43  ;;  %v195_v54 = vsel %vm194_vm0, %v2261_v4, 0.0  ;;  %v198_v4 = vsel %vm194_vm0, %v2292_v13, 0.0  ;;  %v200_v13 = vsel %vm194_vm0, %v2298_v15, 0.0 }
 0x1bb   : > { %v2082_v39 = vpop.eup %2081  ;;  %1912 = vmatprep.subr.bf16.mxu1 %v2032_v53  ;;  %1941 = vmatpush3.bf16.msra.mxu0 %v2036_v2  ;;  %v197_v2 = vsel %vm194_vm0, %v2289_v12, 0.0  ;;  %v199_v12 = vsel %vm194_vm0, %v2295_v14, 0.0  ;;  %v201_v14 = vsel %vm194_vm0, %v2309_v18, 0.0  ;;  %v202_v15 = vsel %vm194_vm0, %v2312_v19, 0.0 }
 0x1bc   : > { %v2637_v41 = vsel %vm464_vm2, %v2082_v39, 0.0  ;;  %1942 = vmatprep.subr.bf16.mxu0 %v2037_v7  ;;  %v196_v39 = vsel %vm194_vm0, %v2264_v5, 0.0  ;;  %v203_v18 = vsel %vm194_vm0, %v2315_v20, 0.0  ;;  %v204_v19 = vsel %vm194_vm0, %v2318_v21, 0.0 }
 0x1bd   : > { %v2084_v61 = vpop.eup %2083  ;;  %571 = vadd.xlane.f32.xlu0 %v2633_v57  ;;  %573 = vadd.xlane.f32.xlu1 %v2637_v41  ;;  %v205_v20 = vsel %vm194_vm0, %v2329_v24, 0.0  ;;  %v206_v21 = vsel %vm194_vm0, %v2332_v25, 0.0  ;;  %v208_v24 = vsel %vm194_vm0, %v2338_v27, 0.0 }
 0x1be   : > { %v2646_v51 = vsel %vm464_vm2, %v2084_v61, 0.0  ;;  %1913 = vmatpush3.bf16.msra.mxu1 %v2032_v53 }
 0x1bf   : > { %v2086_v22 = vpop.eup %2085  ;;  %1943 = vmatpush3.bf16.msra.mxu0 %v2037_v7 }
 0x1c0   : > { %v2650_v52 = vsel %vm464_vm2, %v2086_v22, 0.0  ;;  %1944 = vmatprep.subr.bf16.mxu0 %v2038_v38 }
 0x1c1   : > { %575 = vadd.xlane.f32.xlu0 %v2646_v51  ;;  %577 = vadd.xlane.f32.xlu1 %v2650_v52 }
 0x1c3   : > { %1945 = vmatpush3.bf16.msra.mxu0 %v2038_v38 }
 0x22a   : > { %v542_v9 = vpop.xlane.xlu1 %541 }
 0x22b   : > { %2087 = vrcp.f32 %v542_v9 }
 0x22e   : > { %v546_v11 = vpop.xlane.xlu1 %545  ;;  %v544_v29 = vpop.xlane.xlu0 %543 }
 0x22f   : > { %2089 = vrcp.f32 %v546_v11 }
 0x230   : > { %2091 = vrcp.f32 %v544_v29 }
 0x232   : > { %v550_v44 = vpop.xlane.xlu1 %549  ;;  %v548_v10 = vpop.xlane.xlu0 %547 }
 0x233   : > { %2093 = vrcp.f32 %v550_v44 }
 0x234   : > { %2095 = vrcp.f32 %v548_v10 }
 0x235   : > { %v2088_v34 = vpop.eup %2087 }
 0x236   : > { %v554_v6 = vpop.xlane.xlu1 %553  ;;  %v552_v45 = vpop.xlane.xlu0 %551  ;;  %v580_v16 = vmul.f32 %v2088_v34, %v2521_v59 }
 0x237   : > { %2097 = vrcp.f32 %v554_v6 }
 0x238   : > { %2099 = vrcp.f32 %v552_v45  ;;  %v617_v22 = vmul.f32 %v580_v16, %v195_v54 }
 0x239   : > { %v2090_v8 = vpop.eup %2089 }
 0x23a   : > { %v2092_v17 = vpop.eup %2091  ;;  %v558_v48 = vpop.xlane.xlu1 %557  ;;  %v584_v58 = vmul.f32 %v2090_v8, %v2530_v63 }
 0x23b   : > { %v556_v35 = vpop.xlane.xlu0 %555  ;;  %2101 = vrcp.f32 %v558_v48  ;;  %v582_v43 = vmul.f32 %v2092_v17, %v2534_v0 }
 0x23c   : > { %2103 = vrcp.f32 %v556_v35  ;;  %v619_v38 = vmul.f32 %v584_v58, %v197_v2 }
 0x23d   : > { %v2094_v61 = vpop.eup %2093  ;;  %v618_v53 = vmul.f32 %v582_v43, %v196_v39 }
 0x23e   : > { %v2096_v62 = vpop.eup %2095  ;;  %v562_v59 = vpop.xlane.xlu1 %561  ;;  %v588_v63 = vmul.f32 %v2094_v61, %v2548_v1 }
 0x23f   : > { %v560_v37 = vpop.xlane.xlu0 %559  ;;  %2105 = vrcp.f32 %v562_v59  ;;  %v636_v5 = vpack.c.bf16 %v618_v53, %v617_v22  ;;  %v586_v7 = vmul.f32 %v2096_v62, %v2544_v42 }
 0x240   : > { %2107 = vrcp.f32 %v560_v37  ;;  %v621_v6 = vmul.f32 %v588_v63, %v199_v12  ;;  %v207_v63 = vsel %vm194_vm0, %v2335_v26, 0.0 }
 0x241   : > { %v2098_v0 = vpop.eup %2097  ;;  %1914 = vmatprep.mubr.bf16.mxu1 %v636_v5  ;;  %v620_v9 = vmul.f32 %v586_v7, %v198_v4 }
 0x242   : > { %v2100_v11 = vpop.eup %2099  ;;  %v566_v29 = vpop.xlane.xlu1 %565  ;;  %v592_v1 = vmul.f32 %v2098_v0, %v2562_v28 }
 0x243   : > { %v564_v44 = vpop.xlane.xlu0 %563  ;;  %2109 = vrcp.f32 %v566_v29  ;;  %v637_v10 = vpack.c.bf16 %v620_v9, %v619_v38  ;;  %v590_v42 = vmul.f32 %v2100_v11, %v2558_v50 }
 0x244   : > { %2111 = vrcp.f32 %v564_v44  ;;  %v623_v54 = vmul.f32 %v592_v1, %v201_v14  ;;  %v212_v1 = vsel %vm194_vm0, %v2358_v33, 0.0  ;;  %v2040_v33 = vld [vmem:[%s3024_s1 + $0xb8] sm:$0xff]  }
 0x245   : > { %v2102_v34 = vpop.eup %2101  ;;  %1915 = vmatmul.mubr.bf16.vlgmr.msra.gmra.mrb[0].mxu1 %v637_v10  ;;  %v622_v45 = vmul.f32 %v590_v42, %v200_v13  ;;  %v210_v10 = vsel %vm194_vm0, %v2352_v31, 0.0 }
 0x246   : > { %v2104_v8 = vpop.eup %2103  ;;  %v570_v16 = vpop.xlane.xlu1 %569  ;;  %v596_v28 = vmul.f32 %v2102_v34, %v2579_v60 }
 0x247   : > { %v568_v17 = vpop.xlane.xlu0 %567  ;;  %2113 = vrcp.f32 %v570_v16  ;;  %v638_v48 = vpack.c.bf16 %v622_v45, %v621_v6  ;;  %v594_v50 = vmul.f32 %v2104_v8, %v2575_v23 }
 0x248   : > { %2115 = vrcp.f32 %v568_v17  ;;  %v625_v62 = vmul.f32 %v596_v28, %v203_v18 }
 0x249   : > { %v2106_v35 = vpop.eup %2105  ;;  %1918 = vmatprep.mubr.bf16.mxu1 %v638_v48  ;;  %v624_v39 = vmul.f32 %v594_v50, %v202_v15  ;;  %v2044_v48 = vld [vmem:[%s3024_s1 + $0xd8] sm:$0xff]   ;;  %v2045_v50 = vld [vmem:[%s3024_s1 + $0xe0] sm:$0xff]  }
 0x24a   : > { %v2108_v43 = vpop.eup %2107  ;;  %v574_v61 = vpop.xlane.xlu1 %573  ;;  %v600_v60 = vmul.f32 %v2106_v35, %v2596_v40  ;;  %v2046_v35 = vld [vmem:[%s3024_s1 + $0xe8] sm:$0xff]  }
 0x24b   : > { %v572_v22 = vpop.xlane.xlu0 %571  ;;  %2117 = vrcp.f32 %v574_v61  ;;  %v639_v53 = vpack.c.bf16 %v624_v39, %v623_v54  ;;  %v598_v23 = vmul.f32 %v2108_v43, %v2592_v56  ;;  %v2756_v54 = vld [vmem:[%s3025_s2 + $0x1] ss:$0 sm:$0xff] }
 0x24c   : > { %2119 = vrcp.f32 %v572_v22  ;;  %v627_v0 = vmul.f32 %v600_v60, %v205_v20 }
 0x24d   : > { %v2110_v58 = vpop.eup %2109  ;;  %1919 = vmatmul.mubr.bf16.gmra.mrb[4].mxu1 %v639_v53  ;;  %v626_v59 = vmul.f32 %v598_v23, %v204_v19 }
 0x24e   : > { %v2112_v37 = vpop.eup %2111  ;;  %v578_v2 = vpop.xlane.xlu1 %577  ;;  %v604_v40 = vmul.f32 %v2110_v58, %v2611_v55  ;;  %v209_v55 = vsel %vm194_vm0, %v2349_v30, 0.0 }
 0x24f   : > { %v576_v4 = vpop.xlane.xlu0 %575  ;;  %2121 = vrcp.f32 %v578_v2  ;;  %v640_v5 = vpack.c.bf16 %v626_v59, %v625_v62  ;;  %v602_v56 = vmul.f32 %v2112_v37, %v2607_v49 }
 0x250   : > { %2123 = vrcp.f32 %v576_v4  ;;  %v629_v49 = vmul.f32 %v604_v40, %v207_v63 }
 0x251   : > { %v2114_v7 = vpop.eup %2113  ;;  %1922 = vmatprep.mubr.bf16.mxu1 %v640_v5  ;;  %v628_v38 = vmul.f32 %v602_v56, %v206_v21 }
 0x252   : > { %v2116_v9 = vpop.eup %2115  ;;  %v608_v12 = vmul.f32 %v2114_v7, %v2624_v3  ;;  %v211_v3 = vsel %vm194_vm0, %v2355_v32, 0.0  ;;  %v2039_v32 = vld [vmem:[%s3024_s1 + $0xb0] sm:$0xff]  }
 0x253   : > { %v641_v11 = vpack.c.bf16 %v628_v38, %v627_v0  ;;  %v606_v25 = vmul.f32 %v2116_v9, %v2620_v46  ;;  %1946 = vmatprep.subr.bf16.mxu0 %v2039_v32 }
 0x254   : > { %v631_v34 = vmul.f32 %v608_v12, %v209_v55  ;;  %1947 = vmatpush3.bf16.msra.mxu0 %v2039_v32 }
 0x255   : > { %v2118_v29 = vpop.eup %2117  ;;  %1923 = vmatmul.mubr.bf16.gmra.mrb[8].mxu1 %v641_v11  ;;  %v630_v44 = vmul.f32 %v606_v25, %v208_v24  ;;  %1948 = vmatprep.subr.bf16.mxu0 %v2040_v33 }
 0x256   : > { %v2120_v13 = vpop.eup %2119  ;;  %v612_v6 = vmul.f32 %v2118_v29, %v2637_v41 }
 0x257   : > { %v642_v26 = vpack.c.bf16 %v630_v44, %v629_v49  ;;  %v610_v42 = vmul.f32 %v2120_v13, %v2633_v57  ;;  %v213_v57 = vsel %vm194_vm0, %v2369_v36, 0.0  ;;  %v2041_v36 = vld [vmem:[%s3024_s1 + $0xc0] sm:$0xff]  }
 0x258   : > { %v633_v16 = vmul.f32 %v612_v6, %v211_v3  ;;  %1949 = vmatpush3.bf16.msra.mxu0 %v2040_v33  ;;  %1970 = vmatprep.subr.bf16.mxu1 %v2041_v36 }
 0x259   : > { %v2122_v27 = vpop.eup %2121  ;;  %1926 = vmatprep.mubr.bf16.mxu1 %v642_v26  ;;  %v632_v46 = vmul.f32 %v610_v42, %v210_v10  ;;  %1971 = vmatpush3.bf16.msra.mxu1 %v2041_v36 }
 0x25a   : > { %v2124_v45 = vpop.eup %2123  ;;  %v616_v31 = vmul.f32 %v2122_v27, %v2650_v52  ;;  %v2043_v52 = vld [vmem:[%s3024_s1 + $0xd0] sm:$0xff]  }
 0x25b   : > { %v643_v30 = vpack.c.bf16 %v632_v46, %v631_v34  ;;  %v614_v8 = vmul.f32 %v2124_v45, %v2646_v51  ;;  %v2042_v51 = vld [vmem:[%s3024_s1 + $0xc8] sm:$0xff]  }
 0x25c   : > { %v635_v41 = vmul.f32 %v616_v31, %v213_v57  ;;  %1972 = vmatprep.subr.bf16.mxu1 %v2042_v51 }
 0x25d   : > { %1927 = vmatmul.mubr.bf16.gmra.mrb[12].mxu1 %v643_v30  ;;  %v634_v17 = vmul.f32 %v614_v8, %v212_v1 }
 0x25e   : > { %v645_v15 = vpack.c.bf16 %v635_v41, %v635_v41  ;;  %1973 = vmatpush3.bf16.msra.mxu1 %v2042_v51 }
 0x25f   : > { %v644_v14 = vpack.c.bf16 %v634_v17, %v633_v16  ;;  %1974 = vmatprep.subr.bf16.mxu1 %v2043_v52 }
 0x261   : > { %1930 = vmatprep.mubr.bf16.mxu1 %v644_v14 }
 0x262   : > { %1975 = vmatpush3.bf16.msra.mxu1 %v2043_v52 }
 0x263   : > { %1976 = vmatprep.subr.bf16.mxu1 %v2044_v48 }
 0x265   : > { %1931 = vmatmul.mubr.bf16.gmra.mrb[16].mxu1 %v645_v15 }
 0x266   : > { %1977 = vmatpush3.bf16.msra.mxu1 %v2044_v48 }
 0x267   : > { %1978 = vmatprep.subr.bf16.mxu1 %v2045_v50 }
 0x26a   : > { %1979 = vmatpush3.bf16.msra.mxu1 %v2045_v50 }
 0x26b   : > { %1980 = vmatprep.subr.bf16.mxu1 %v2046_v35 }
 0x26e   : > { %1981 = vmatpush3.bf16.msra.mxu1 %v2046_v35 }
 0x318   : > { %v1916_v39 = vpop.f32.mrb[0].mxu1 }
 0x319   : > { %v758_v28 = vadd.f32 %v1916_v39, %v2756_v54  ;;  %v749_v43 = vpop.f32.mrb[1].mxu1 }
 0x31a   : > { %v750_v61 = vadd.f32 %v2756_v54, %v749_v43  ;;  %v1917_v22 = vpop.f32.mrb[2].mxu1 }
 0x31b   : > { %v829_v18 = vmul.f32 0.2, %v758_v28  ;;  %v761_v19 = vadd.f32 %v1917_v22, %v2756_v54  ;;  %v752_v53 = vpop.f32.mrb[3].mxu1 }
 0x31c   : > { %v827_v23 = vmul.f32 0.2, %v750_v61  ;;  %v753_v58 = vadd.f32 %v2756_v54, %v752_v53 }
 0x31d   : > { %v830_v62 = vmul.f32 0.2, %v761_v19  ;;  %v848_v60 = vmax.f32 %v758_v28, %v829_v18 }
 0x31e   : > { %v828_v59 = vmul.f32 0.2, %v753_v58  ;;  %v846_v2 = vmax.f32 %v750_v61, %v827_v23 }
 0x31f   : > { %v849_v37 = vmax.f32 %v761_v19, %v830_v62 }
 0x320   : > { %v847_v4 = vmax.f32 %v753_v58, %v828_v59  ;;  %v1920_v20 = vpop.f32.mrb[4].mxu1 }
 0x321   : > { %v866_v21 = vpack.c.bf16 %v849_v37, %v848_v60  ;;  %v774_v5 = vadd.f32 %v1920_v20, %v2756_v54  ;;  %v765_v56 = vpop.f32.mrb[5].mxu1 }
 0x322   : > { %v766_v7 = vadd.f32 %v2756_v54, %v765_v56  ;;  %v1921_v0 = vpop.f32.mrb[6].mxu1  ;;  %v865_v38 = vpack.c.bf16 %v847_v4, %v846_v2 }
 0x323   : > { %v833_v40 = vmul.f32 0.2, %v774_v5  ;;  %v777_v9 = vadd.f32 %v1921_v0, %v2756_v54  ;;  %v768_v63 = vpop.f32.mrb[7].mxu1 }
 0x324   : > { %v831_v24 = vmul.f32 0.2, %v766_v7  ;;  %v769_v11 = vadd.f32 %v2756_v54, %v768_v63  ;;  %1950 = vmatprep.mubr.bf16.mxu0 %v865_v38  ;;  %v2047_v63 = vld [vmem:[%s3024_s1 + $0xf0] sm:$0xff]  }
 0x325   : > { %v834_v25 = vmul.f32 0.2, %v777_v9  ;;  %1951 = vmatmul.mubr.bf16.vlgmr.msra.gmra.mrb[20].mxu0 %v866_v21  ;;  %v852_v49 = vmax.f32 %v774_v5, %v833_v40  ;;  %1982 = vmatprep.subr.bf16.mxu1 %v2047_v63 }
 0x326   : > { %v832_v29 = vmul.f32 0.2, %v769_v11  ;;  %v850_v12 = vmax.f32 %v766_v7, %v831_v24  ;;  %1983 = vmatpush3.bf16.msra.mxu1 %v2047_v63  ;;  %v2786_v24 = vld [vmem:[%s3025_s2 + $0x2] ss:$0 sm:$0xff] }
 0x327   : > { %v853_v44 = vmax.f32 %v777_v9, %v834_v25 }
 0x328   : > { %v851_v13 = vmax.f32 %v769_v11, %v832_v29  ;;  %v1924_v55 = vpop.f32.mrb[8].mxu1 }
 0x329   : > { %v790_v10 = vadd.f32 %v1924_v55, %v2756_v54  ;;  %v781_v26 = vpop.f32.mrb[9].mxu1  ;;  %v868_v42 = vpack.c.bf16 %v853_v44, %v852_v49 }
 0x32a   : > { %v782_v27 = vadd.f32 %v2756_v54, %v781_v26  ;;  %v1925_v34 = vpop.f32.mrb[10].mxu1  ;;  %v867_v46 = vpack.c.bf16 %v851_v13, %v850_v12 }
 0x32b   : > { %v837_v6 = vmul.f32 0.2, %v790_v10  ;;  %v793_v45 = vadd.f32 %v1925_v34, %v2756_v54  ;;  %v784_v3 = vpop.f32.mrb[11].mxu1 }
 0x32c   : > { %v835_v1 = vmul.f32 0.2, %v782_v27  ;;  %v785_v30 = vadd.f32 %v2756_v54, %v784_v3  ;;  %1954 = vmatprep.mubr.bf16.mxu0 %v867_v46 }
 0x32d   : > { %v838_v8 = vmul.f32 0.2, %v793_v45  ;;  %1955 = vmatmul.mubr.bf16.gmra.mrb[24].mxu0 %v868_v42  ;;  %v856_v57 = vmax.f32 %v790_v10, %v837_v6 }
 0x32e   : > { %v836_v31 = vmul.f32 0.2, %v785_v30  ;;  %v854_v17 = vmax.f32 %v782_v27, %v835_v1 }
 0x32f   : > { %v857_v16 = vmax.f32 %v793_v45, %v838_v8 }
 0x330   : > { %v855_v14 = vmax.f32 %v785_v30, %v836_v31  ;;  %v1928_v41 = vpop.f32.mrb[12].mxu1 }
 0x331   : > { %v806_v15 = vadd.f32 %v1928_v41, %v2756_v54  ;;  %v797_v32 = vpop.f32.mrb[13].mxu1  ;;  %v870_v33 = vpack.c.bf16 %v857_v16, %v856_v57 }
 0x332   : > { %v798_v36 = vadd.f32 %v2756_v54, %v797_v32  ;;  %v1929_v51 = vpop.f32.mrb[14].mxu1  ;;  %v869_v52 = vpack.c.bf16 %v855_v14, %v854_v17 }
 0x333   : > { %v841_v48 = vmul.f32 0.2, %v806_v15  ;;  %v809_v50 = vadd.f32 %v1929_v51, %v2756_v54  ;;  %v800_v35 = vpop.f32.mrb[15].mxu1 }
 0x334   : > { %v839_v39 = vmul.f32 0.2, %v798_v36  ;;  %v801_v28 = vadd.f32 %v2756_v54, %v800_v35  ;;  %1958 = vmatprep.mubr.bf16.mxu0 %v869_v52 }
 0x335   : > { %v842_v43 = vmul.f32 0.2, %v809_v50  ;;  %1959 = vmatmul.mubr.bf16.gmra.mrb[28].mxu0 %v870_v33  ;;  %v860_v22 = vmax.f32 %v806_v15, %v841_v48 }
 0x336   : > { %v840_v61 = vmul.f32 0.2, %v801_v28  ;;  %v858_v19 = vmax.f32 %v798_v36, %v839_v39 }
 0x337   : > { %v861_v18 = vmax.f32 %v809_v50, %v842_v43 }
 0x338   : > { %v859_v53 = vmax.f32 %v801_v28, %v840_v61  ;;  %v1932_v23 = vpop.f32.mrb[16].mxu1 }
 0x339   : > { %v822_v58 = vadd.f32 %v1932_v23, %v2756_v54  ;;  %v813_v62 = vpop.f32.mrb[17].mxu1  ;;  %v872_v59 = vpack.c.bf16 %v861_v18, %v860_v22 }
 0x33a   : > { %v814_v60 = vadd.f32 %v2756_v54, %v813_v62  ;;  %v1933_v37 = vpop.f32.mrb[18].mxu1  ;;  %v871_v2 = vpack.c.bf16 %v859_v53, %v858_v19 }
 0x33b   : > { %v845_v4 = vmul.f32 0.2, %v822_v58  ;;  %v816_v20 = vpop.f32.mrb[19].mxu1 }
 0x33c   : > { %v843_v21 = vmul.f32 0.2, %v814_v60  ;;  %v817_v5 = vadd.f32 %v2756_v54, %v816_v20  ;;  %1962 = vmatprep.mubr.bf16.mxu0 %v871_v2  ;;  %v2048_v54 = vld [vmem:[%s3024_s1 + $0xf8] sm:$0xff]  }
 0x33d   : > { %1963 = vmatmul.mubr.bf16.gmra.mrb[32].mxu0 %v872_v59  ;;  %v864_v7 = vmax.f32 %v822_v58, %v845_v4  ;;  %1984 = vmatprep.subr.bf16.mxu1 %v2048_v54 }
 0x33e   : > { %v844_v56 = vmul.f32 0.2, %v817_v5  ;;  %v862_v0 = vmax.f32 %v814_v60, %v843_v21  ;;  %1985 = vmatpush3.bf16.msra.mxu1 %v2048_v54 }
 0x33f   : > { %v874_v9 = vpack.c.bf16 %v864_v7, %v864_v7 }
 0x340   : > { %v863_v38 = vmax.f32 %v817_v5, %v844_v56 }
 0x342   : > { %v873_v40 = vpack.c.bf16 %v863_v38, %v862_v0 }
 0x344   : > { %1966 = vmatprep.mubr.bf16.mxu0 %v873_v40 }
 0x345   : > { %1967 = vmatmul.mubr.bf16.gmra.mrb[36].mxu0 %v874_v9 }
 0x3f8   : > { %v1952_v11 = vpop.f32.mrb[20].mxu0 }
 0x3f9   : > { %v987_v25 = vadd.f32 %v1952_v11, %v2786_v24  ;;  %v978_v29 = vpop.f32.mrb[21].mxu0 }
 0x3fa   : > { %v979_v49 = vadd.f32 %v2786_v24, %v978_v29  ;;  %v1953_v44 = vpop.f32.mrb[22].mxu0 }
 0x3fb   : > { %v1058_v12 = vmul.f32 0.2, %v987_v25  ;;  %v990_v13 = vadd.f32 %v1953_v44, %v2786_v24  ;;  %v981_v55 = vpop.f32.mrb[23].mxu0 }
 0x3fc   : > { %v1056_v10 = vmul.f32 0.2, %v979_v49  ;;  %v982_v26 = vadd.f32 %v2786_v24, %v981_v55 }
 0x3fd   : > { %v1059_v42 = vmul.f32 0.2, %v990_v13  ;;  %v1077_v34 = vmax.f32 %v987_v25, %v1058_v12 }
 0x3fe   : > { %v1057_v27 = vmul.f32 0.2, %v982_v26  ;;  %v1075_v6 = vmax.f32 %v979_v49, %v1056_v10 }
 0x3ff   : > { %v1078_v46 = vmax.f32 %v990_v13, %v1059_v42 }
 0x400   : > { %v1076_v45 = vmax.f32 %v982_v26, %v1057_v27  ;;  %v1956_v3 = vpop.f32.mrb[24].mxu0 }
 0x401   : > { %v1095_v1 = vpack.c.bf16 %v1078_v46, %v1077_v34  ;;  %v1003_v30 = vadd.f32 %v1956_v3, %v2786_v24  ;;  %v994_v8 = vpop.f32.mrb[25].mxu0 }
 0x402   : > { %v995_v31 = vadd.f32 %v2786_v24, %v994_v8  ;;  %v1957_v57 = vpop.f32.mrb[26].mxu0  ;;  %v1094_v16 = vpack.c.bf16 %v1076_v45, %v1075_v6 }
 0x403   : > { %v1062_v17 = vmul.f32 0.2, %v1003_v30  ;;  %v1006_v14 = vadd.f32 %v1957_v57, %v2786_v24  ;;  %v997_v41 = vpop.f32.mrb[27].mxu0 }
 0x404   : > { %v1060_v15 = vmul.f32 0.2, %v995_v31  ;;  %v998_v32 = vadd.f32 %v2786_v24, %v997_v41  ;;  %1986 = vmatprep.mubr.bf16.mxu1 %v1094_v16  ;;  %v2810_v41 = vld [vmem:[%s3025_s2 + $0x3] ss:$0 sm:$0xff] }
 0x405   : > { %v1063_v33 = vmul.f32 0.2, %v1006_v14  ;;  %1987 = vmatmul.mubr.bf16.vlgmr.msra.gmra.mrb[20].mxu1 %v1095_v1  ;;  %v1081_v51 = vmax.f32 %v1003_v30, %v1062_v17 }
 0x406   : > { %v1061_v36 = vmul.f32 0.2, %v998_v32  ;;  %v1079_v48 = vmax.f32 %v995_v31, %v1060_v15 }
 0x407   : > { %v1082_v52 = vmax.f32 %v1006_v14, %v1063_v33 }
 0x408   : > { %v1080_v50 = vmax.f32 %v998_v32, %v1061_v36  ;;  %v1960_v35 = vpop.f32.mrb[28].mxu0 }
 0x409   : > { %v1019_v39 = vadd.f32 %v1960_v35, %v2786_v24  ;;  %v1010_v28 = vpop.f32.mrb[29].mxu0  ;;  %v1097_v43 = vpack.c.bf16 %v1082_v52, %v1081_v51 }
 0x40a   : > { %v1011_v61 = vadd.f32 %v2786_v24, %v1010_v28  ;;  %v1961_v22 = vpop.f32.mrb[30].mxu0  ;;  %v1096_v18 = vpack.c.bf16 %v1080_v50, %v1079_v48 }
 0x40b   : > { %v1066_v19 = vmul.f32 0.2, %v1019_v39  ;;  %v1022_v53 = vadd.f32 %v1961_v22, %v2786_v24  ;;  %v1013_v23 = vpop.f32.mrb[31].mxu0 }
 0x40c   : > { %v1064_v58 = vmul.f32 0.2, %v1011_v61  ;;  %v1014_v62 = vadd.f32 %v2786_v24, %v1013_v23  ;;  %1990 = vmatprep.mubr.bf16.mxu1 %v1096_v18 }
 0x40d   : > { %v1067_v59 = vmul.f32 0.2, %v1022_v53  ;;  %1991 = vmatmul.mubr.bf16.gmra.mrb[24].mxu1 %v1097_v43  ;;  %v1085_v37 = vmax.f32 %v1019_v39, %v1066_v19  ;;  %v2819_v39 = vld [vmem:[%s3025_s2 + $0x4] ss:$0 sm:$0xff] }
 0x40e   : > { %v1065_v60 = vmul.f32 0.2, %v1014_v62  ;;  %v1083_v4 = vmax.f32 %v1011_v61, %v1064_v58 }
 0x40f   : > { %v1086_v2 = vmax.f32 %v1022_v53, %v1067_v59 }
 0x410   : > { %v1084_v20 = vmax.f32 %v1014_v62, %v1065_v60  ;;  %v1964_v21 = vpop.f32.mrb[32].mxu0 }
 0x411   : > { %v1035_v5 = vadd.f32 %v1964_v21, %v2786_v24  ;;  %v1026_v56 = vpop.f32.mrb[33].mxu0  ;;  %v1099_v7 = vpack.c.bf16 %v1086_v2, %v1085_v37 }
 0x412   : > { %v1027_v0 = vadd.f32 %v2786_v24, %v1026_v56  ;;  %v1965_v38 = vpop.f32.mrb[34].mxu0  ;;  %v1098_v40 = vpack.c.bf16 %v1084_v20, %v1083_v4 }
 0x413   : > { %v1070_v9 = vmul.f32 0.2, %v1035_v5  ;;  %v1038_v63 = vadd.f32 %v1965_v38, %v2786_v24  ;;  %v1029_v54 = vpop.f32.mrb[35].mxu0 }
 0x414   : > { %v1068_v11 = vmul.f32 0.2, %v1027_v0  ;;  %v1030_v25 = vadd.f32 %v2786_v24, %v1029_v54  ;;  %1994 = vmatprep.mubr.bf16.mxu1 %v1098_v40 }
 0x415   : > { %v1071_v29 = vmul.f32 0.2, %v1038_v63  ;;  %1995 = vmatmul.mubr.bf16.gmra.mrb[28].mxu1 %v1099_v7  ;;  %v1089_v44 = vmax.f32 %v1035_v5, %v1070_v9 }
 0x416   : > { %v1069_v49 = vmul.f32 0.2, %v1030_v25  ;;  %v1087_v13 = vmax.f32 %v1027_v0, %v1068_v11 }
 0x417   : > { %v1090_v12 = vmax.f32 %v1038_v63, %v1071_v29 }
 0x418   : > { %v1088_v55 = vmax.f32 %v1030_v25, %v1069_v49  ;;  %v1968_v10 = vpop.f32.mrb[36].mxu0 }
 0x419   : > { %v1051_v26 = vadd.f32 %v1968_v10, %v2786_v24  ;;  %v1042_v42 = vpop.f32.mrb[37].mxu0  ;;  %v1101_v27 = vpack.c.bf16 %v1090_v12, %v1089_v44 }
 0x41a   : > { %v1043_v34 = vadd.f32 %v2786_v24, %v1042_v42  ;;  %v1969_v46 = vpop.f32.mrb[38].mxu0  ;;  %v1100_v6 = vpack.c.bf16 %v1088_v55, %v1087_v13 }
 0x41b   : > { %v1074_v45 = vmul.f32 0.2, %v1051_v26  ;;  %v1045_v3 = vpop.f32.mrb[39].mxu0 }
 0x41c   : > { %v1072_v1 = vmul.f32 0.2, %v1043_v34  ;;  %v1046_v30 = vadd.f32 %v2786_v24, %v1045_v3  ;;  %1998 = vmatprep.mubr.bf16.mxu1 %v1100_v6 }
 0x41d   : > { %1999 = vmatmul.mubr.bf16.gmra.mrb[32].mxu1 %v1101_v27  ;;  %v1093_v31 = vmax.f32 %v1051_v26, %v1074_v45 }
 0x41e   : > { %v1073_v8 = vmul.f32 0.2, %v1046_v30  ;;  %v1091_v57 = vmax.f32 %v1043_v34, %v1072_v1 }
 0x41f   : > { %v1103_v14 = vpack.c.bf16 %v1093_v31, %v1093_v31 }
 0x420   : > { %v1092_v16 = vmax.f32 %v1046_v30, %v1073_v8 }
 0x422   : > { %v1102_v17 = vpack.c.bf16 %v1092_v16, %v1091_v57 }
 0x424   : > { %2002 = vmatprep.mubr.bf16.mxu1 %v1102_v17 }
 0x425   : > { %2003 = vmatmul.mubr.bf16.gmra.mrb[36].mxu1 %v1103_v14 }
 0x4d8   : > { %v1988_v15 = vpop.f32.mrb[20].mxu1 }
 0x4d9   : > { %v1216_v32 = vadd.f32 %v1988_v15, %v2810_v41  ;;  %v1207_v33 = vpop.f32.mrb[21].mxu1 }
 0x4da   : > { %v1208_v24 = vadd.f32 %v2810_v41, %v1207_v33  ;;  %v1989_v36 = vpop.f32.mrb[22].mxu1 }
 0x4db   : > { %v1287_v51 = vmul.f32 0.2, %v1216_v32  ;;  %v1219_v52 = vadd.f32 %v1989_v36, %v2810_v41  ;;  %v1210_v48 = vpop.f32.mrb[23].mxu1 }
 0x4dc   : > { %v1285_v50 = vmul.f32 0.2, %v1208_v24  ;;  %v1211_v35 = vadd.f32 %v2810_v41, %v1210_v48 }
 0x4dd   : > { %v2821_v28 = vmax.f32 %v1216_v32, %v1287_v51  ;;  %v1288_v43 = vmul.f32 0.2, %v1219_v52 }
 0x4de   : > { %v1286_v61 = vmul.f32 0.2, %v1211_v35  ;;  %v2823_v22 = vmax.f32 %v1208_v24, %v1285_v50 }
 0x4df   : > { %v2825_v18 = vmax.f32 %v1219_v52, %v1288_v43  ;;  %v1331_v19 = vmul.f32 %v2819_v39, %v2821_v28 }
 0x4e0   : > { %v1992_v53 = vpop.f32.mrb[24].mxu1  ;;  %v2829_v23 = vmax.f32 %v1211_v35, %v1286_v61  ;;  %v1329_v21 = vmul.f32 %v2819_v39, %v2823_v22 }
 0x4e1   : > { %v1232_v58 = vadd.f32 %v1992_v53, %v2810_v41  ;;  %1352 = vadd.xlane.f32.xlu0 %v1331_v19  ;;  %v1223_v62 = vpop.f32.mrb[25].mxu1  ;;  %v1332_v59 = vmul.f32 %v2819_v39, %v2825_v18 }
 0x4e2   : > { %v1224_v60 = vadd.f32 %v2810_v41, %v1223_v62  ;;  %v1993_v37 = vpop.f32.mrb[26].mxu1  ;;  %v1330_v38 = vmul.f32 %v2819_v39, %v2829_v23 }
 0x4e3   : > { %v1291_v2 = vmul.f32 0.2, %v1232_v58  ;;  %v1235_v4 = vadd.f32 %v1993_v37, %v2810_v41  ;;  %1354 = vadd.xlane.f32.xlu1 %v1332_v59  ;;  %v1226_v20 = vpop.f32.mrb[27].mxu1 }
 0x4e4   : > { %v1289_v5 = vmul.f32 0.2, %v1224_v60  ;;  %v1227_v56 = vadd.f32 %v2810_v41, %v1226_v20 }
 0x4e5   : > { %v2839_v7 = vmax.f32 %v1232_v58, %v1291_v2  ;;  %v1292_v0 = vmul.f32 0.2, %v1235_v4  ;;  %1348 = vadd.xlane.f32.xlu0 %v1329_v21 }
 0x4e6   : > { %v1290_v40 = vmul.f32 0.2, %v1227_v56  ;;  %v2843_v9 = vmax.f32 %v1224_v60, %v1289_v5 }
 0x4e7   : > { %v2845_v63 = vmax.f32 %v1235_v4, %v1292_v0  ;;  %1350 = vadd.xlane.f32.xlu1 %v1330_v38  ;;  %v1335_v54 = vmul.f32 %v2819_v39, %v2839_v7 }
 0x4e8   : > { %v1996_v11 = vpop.f32.mrb[28].mxu1  ;;  %v2849_v25 = vmax.f32 %v1227_v56, %v1290_v40  ;;  %v1333_v42 = vmul.f32 %v2819_v39, %v2843_v9 }
 0x4e9   : > { %v1248_v29 = vadd.f32 %v1996_v11, %v2810_v41  ;;  %v1239_v49 = vpop.f32.mrb[29].mxu1  ;;  %1360 = vadd.xlane.f32.xlu0 %v1335_v54  ;;  %v1336_v44 = vmul.f32 %v2819_v39, %v2845_v63 }
 0x4ea   : > { %v1240_v12 = vadd.f32 %v2810_v41, %v1239_v49  ;;  %v1997_v13 = vpop.f32.mrb[30].mxu1  ;;  %v1334_v45 = vmul.f32 %v2819_v39, %v2849_v25 }
 0x4eb   : > { %v1295_v55 = vmul.f32 0.2, %v1248_v29  ;;  %v1251_v10 = vadd.f32 %v1997_v13, %v2810_v41  ;;  %v1242_v26 = vpop.f32.mrb[31].mxu1  ;;  %1362 = vadd.xlane.f32.xlu1 %v1336_v44  ;;  %v2209_v13 = vmov 0  }
 0x4ec   : > { %v1293_v27 = vmul.f32 0.2, %v1240_v12  ;;  %v1243_v34 = vadd.f32 %v2810_v41, %v1242_v26  ;;  %2015 = vset.pattern.permute.xlu1 %v2209_v13  ;;  %2016 = vset.pattern.permute.xlu0 %v2209_v13 }
 0x4ed   : > { %v2859_v46 = vmax.f32 %v1248_v29, %v1295_v55  ;;  %v1296_v6 = vmul.f32 0.2, %v1251_v10  ;;  %1356 = vadd.xlane.f32.xlu0 %v1333_v42  ;;  %v2915_v55 = vld [vmem:[%s3025_s2 + $0x5] ss:$0 sm:$0xff] }
 0x4ee   : > { %v1294_v3 = vmul.f32 0.2, %v1243_v34  ;;  %v2863_v1 = vmax.f32 %v1240_v12, %v1293_v27 }
 0x4ef   : > { %v2865_v30 = vmax.f32 %v1251_v10, %v1296_v6  ;;  %1358 = vadd.xlane.f32.xlu1 %v1334_v45  ;;  %v1339_v8 = vmul.f32 %v2819_v39, %v2859_v46 }
 0x4f0   : > { %v2000_v31 = vpop.f32.mrb[32].mxu1  ;;  %v2869_v57 = vmax.f32 %v1243_v34, %v1294_v3  ;;  %v1337_v51 = vmul.f32 %v2819_v39, %v2863_v1 }
 0x4f1   : > { %v1264_v16 = vadd.f32 %v2000_v31, %v2810_v41  ;;  %v1255_v17 = vpop.f32.mrb[33].mxu1  ;;  %1368 = vadd.xlane.f32.xlu0 %v1339_v8  ;;  %v1340_v14 = vmul.f32 %v2819_v39, %v2865_v30 }
 0x4f2   : > { %v1256_v15 = vadd.f32 %v2810_v41, %v1255_v17  ;;  %v2001_v32 = vpop.f32.mrb[34].mxu1  ;;  %v1338_v43 = vmul.f32 %v2819_v39, %v2869_v57 }
 0x4f3   : > { %v1299_v33 = vmul.f32 0.2, %v1264_v16  ;;  %v1267_v24 = vadd.f32 %v2001_v32, %v2810_v41  ;;  %v1258_v36 = vpop.f32.mrb[35].mxu1  ;;  %1370 = vadd.xlane.f32.xlu1 %v1340_v14 }
 0x4f4   : > { %v1297_v52 = vmul.f32 0.2, %v1256_v15  ;;  %v1259_v48 = vadd.f32 %v2810_v41, %v1258_v36 }
 0x4f5   : > { %v2879_v50 = vmax.f32 %v1264_v16, %v1299_v33  ;;  %v1300_v35 = vmul.f32 0.2, %v1267_v24  ;;  %1364 = vadd.xlane.f32.xlu0 %v1337_v51 }
 0x4f6   : > { %v1298_v61 = vmul.f32 0.2, %v1259_v48  ;;  %v2883_v19 = vmax.f32 %v1256_v15, %v1297_v52 }
 0x4f7   : > { %v2885_v53 = vmax.f32 %v1267_v24, %v1300_v35  ;;  %1366 = vadd.xlane.f32.xlu1 %v1338_v43  ;;  %v1343_v58 = vmul.f32 %v2819_v39, %v2879_v50 }
 0x4f8   : > { %v2004_v62 = vpop.f32.mrb[36].mxu1  ;;  %v2889_v59 = vmax.f32 %v1259_v48, %v1298_v61  ;;  %v1341_v5 = vmul.f32 %v2819_v39, %v2883_v19 }
 0x4f9   : > { %v1280_v60 = vadd.f32 %v2004_v62, %v2810_v41  ;;  %v1271_v37 = vpop.f32.mrb[37].mxu1  ;;  %1376 = vadd.xlane.f32.xlu0 %v1343_v58  ;;  %v1344_v2 = vmul.f32 %v2819_v39, %v2885_v53 }
 0x4fa   : > { %v1272_v4 = vadd.f32 %v2810_v41, %v1271_v37  ;;  %v2005_v20 = vpop.f32.mrb[38].mxu1  ;;  %v1342_v40 = vmul.f32 %v2819_v39, %v2889_v59 }
 0x4fb   : > { %v1274_v21 = vpop.f32.mrb[39].mxu1  ;;  %1378 = vadd.xlane.f32.xlu1 %v1344_v2  ;;  %v1303_v56 = vmul.f32 0.2, %v1280_v60 }
 0x4fc   : > { %v1301_v0 = vmul.f32 0.2, %v1272_v4  ;;  %v1275_v38 = vadd.f32 %v2810_v41, %v1274_v21 }
 0x4fd   : > { %1372 = vadd.xlane.f32.xlu0 %v1341_v5  ;;  %v2902_v29 = vmax.f32 %v1280_v60, %v1303_v56 }
 0x4fe   : > { %v2900_v54 = vmax.f32 %v1272_v4, %v1301_v0  ;;  %v1302_v11 = vmul.f32 0.2, %v1275_v38 }
 0x4ff   : > { %1374 = vadd.xlane.f32.xlu1 %v1342_v40  ;;  %v1347_v41 = vmul.f32 %v2819_v39, %v2902_v29 }
 0x500   : > { %v2904_v49 = vmax.f32 %v1275_v38, %v1302_v11  ;;  %v1345_v44 = vmul.f32 %v2819_v39, %v2900_v54 }
 0x502   : > { %1380 = vadd.xlane.f32.xlu0 %v1345_v44  ;;  %v1346_v12 = vmul.f32 %v2819_v39, %v2904_v49 }
 0x504   : > { %1382 = vadd.xlane.f32.xlu1 %v1346_v12 }
 0x506   : > { %1384 = vadd.xlane.f32.xlu0 %v1347_v41 }
 0x56e   : > { %v1353_v10 = vpop.xlane.xlu0 %1352 }
 0x56f   : > { %v1392_v26 = vadd.f32 %v2915_v55, %v1353_v10 }
 0x570   : > { %v1355_v42 = vpop.xlane.xlu1 %1354 }
 0x571   : > { %v1411_v27 = vsub.f32 0.0, %v1392_v26  ;;  %v1393_v34 = vadd.f32 %v2915_v55, %v1355_v42 }
 0x572   : > { %v1349_v6 = vpop.xlane.xlu0 %1348 }
 0x573   : > { %v1432_v45 = vmul.f32 1.442695, %v1411_v27  ;;  %v1412_v3 = vsub.f32 0.0, %v1393_v34  ;;  %v1390_v39 = vadd.f32 %v2915_v55, %v1349_v6 }
 0x574   : > { %v1351_v8 = vpop.xlane.xlu1 %1350 }
 0x575   : > { %2125 = vpow2.f32 %v1432_v45  ;;  %v1434_v31 = vmul.f32 1.442695, %v1412_v3  ;;  %v1409_v16 = vsub.f32 0.0, %v1390_v39  ;;  %v1391_v17 = vadd.f32 %v2915_v55, %v1351_v8 }
 0x576   : > { %v1361_v14 = vpop.xlane.xlu0 %1360 }
 0x577   : > { %v1428_v15 = vmul.f32 1.442695, %v1409_v16  ;;  %v1410_v32 = vsub.f32 0.0, %v1391_v17  ;;  %v1396_v33 = vadd.f32 %v2915_v55, %v1361_v14  ;;  %2127 = vpow2.f32 %v1434_v31 }
 0x578   : > { %v1363_v24 = vpop.xlane.xlu1 %1362 }
 0x579   : > { %2129 = vpow2.f32 %v1428_v15  ;;  %v1430_v36 = vmul.f32 1.442695, %v1410_v32  ;;  %v1415_v51 = vsub.f32 0.0, %v1396_v33  ;;  %v1397_v52 = vadd.f32 %v2915_v55, %v1363_v24 }
 0x57a   : > { %v1357_v48 = vpop.xlane.xlu0 %1356 }
 0x57b   : > { %2131 = vpow2.f32 %v1430_v36  ;;  %v1440_v35 = vmul.f32 1.442695, %v1415_v51  ;;  %v1394_v43 = vadd.f32 %v2915_v55, %v1357_v48  ;;  %v1416_v61 = vsub.f32 0.0, %v1397_v52 }
 0x57c   : > { %v1359_v58 = vpop.xlane.xlu1 %1358 }
 0x57d   : > { %2133 = vpow2.f32 %v1440_v35  ;;  %v1413_v62 = vsub.f32 0.0, %v1394_v43  ;;  %v1395_v60 = vadd.f32 %v2915_v55, %v1359_v58  ;;  %v1442_v56 = vmul.f32 1.442695, %v1416_v61 }
 0x57e   : > { %v1369_v37 = vpop.xlane.xlu0 %1368 }
 0x57f   : > { %v2126_v2 = vpop.eup %2125  ;;  %v1436_v4 = vmul.f32 1.442695, %v1413_v62  ;;  %v1414_v20 = vsub.f32 0.0, %v1395_v60  ;;  %v1400_v21 = vadd.f32 %v2915_v55, %v1369_v37 }
 0x580   : > { %v1468_v5 = vadd.f32 1.0, %v2126_v2  ;;  %v1371_v0 = vpop.xlane.xlu1 %1370 }
 0x581   : > { %2135 = vpow2.f32 %v1436_v4  ;;  %v1419_v38 = vsub.f32 0.0, %v1400_v21  ;;  %v2128_v40 = vpop.eup %2127  ;;  %v1438_v12 = vmul.f32 1.442695, %v1414_v20  ;;  %v1401_v13 = vadd.f32 %v2915_v55, %v1371_v0 }
 0x582   : > { %2137 = vrcp.f32 %v1468_v5  ;;  %v1365_v11 = vpop.xlane.xlu0 %1364  ;;  %v1469_v6 = vadd.f32 1.0, %v2128_v40 }
 0x583   : > { %v2130_v44 = vpop.eup %2129  ;;  %v1448_v41 = vmul.f32 1.442695, %v1419_v38  ;;  %v1398_v10 = vadd.f32 %v2915_v55, %v1365_v11  ;;  %2139 = vpow2.f32 %v1442_v56  ;;  %v1420_v8 = vsub.f32 0.0, %v1401_v13 }
 0x584   : > { %v1466_v26 = vadd.f32 1.0, %v2130_v44  ;;  %v1367_v42 = vpop.xlane.xlu1 %1366 }
 0x585   : > { %v2132_v27 = vpop.eup %2131  ;;  %2141 = vpow2.f32 %v1448_v41  ;;  %v1417_v34 = vsub.f32 0.0, %v1398_v10  ;;  %v1399_v14 = vadd.f32 %v2915_v55, %v1367_v42  ;;  %v1450_v36 = vmul.f32 1.442695, %v1420_v8 }
 0x586   : > { %2143 = vrcp.f32 %v1466_v26  ;;  %v1467_v45 = vadd.f32 1.0, %v2132_v27  ;;  %v1377_v3 = vpop.xlane.xlu0 %1376 }
 0x587   : > { %v2134_v39 = vpop.eup %2133  ;;  %2145 = vpow2.f32 %v1438_v12  ;;  %v1404_v31 = vadd.f32 %v2915_v55, %v1377_v3  ;;  %v1444_v16 = vmul.f32 1.442695, %v1417_v34  ;;  %v1418_v58 = vsub.f32 0.0, %v1399_v14 }
 0x588   : > { %2147 = vrcp.f32 %v1467_v45  ;;  %v1379_v17 = vpop.xlane.xlu1 %1378  ;;  %v1472_v32 = vadd.f32 1.0, %v2134_v39 }
 0x589   : > { %v1423_v15 = vsub.f32 0.0, %v1404_v31  ;;  %2149 = vrcp.f32 %v1469_v6  ;;  %v1405_v52 = vadd.f32 %v2915_v55, %v1379_v17  ;;  %v1446_v40 = vmul.f32 1.442695, %v1418_v58 }
 0x58a   : > { %v1373_v33 = vpop.xlane.xlu0 %1372  ;;  %2151 = vpow2.f32 %v1444_v16 }
 0x58b   : > { %v2136_v24 = vpop.eup %2135  ;;  %v1456_v51 = vmul.f32 1.442695, %v1423_v15  ;;  %v1402_v48 = vadd.f32 %v2915_v55, %v1373_v33  ;;  %v1424_v2 = vsub.f32 0.0, %v1405_v52 }
 0x58c   : > { %v2138_v35 = vpop.eup %2137  ;;  %v1470_v43 = vadd.f32 1.0, %v2136_v24  ;;  %v1375_v61 = vpop.xlane.xlu1 %1374 }
 0x58d   : > { %2153 = vpow2.f32 %v1456_v51  ;;  %v1421_v62 = vsub.f32 0.0, %v1402_v48  ;;  %1536 = vperm.xlu1 %2015, %v2138_v35   ;;  %v2140_v60 = vpop.eup %2139  ;;  %v1403_v56 = vadd.f32 %v2915_v55, %v1375_v61  ;;  %v1458_v26 = vmul.f32 1.442695, %v1424_v2 }
 0x58e   : > { %2155 = vrcp.f32 %v1472_v32  ;;  %v1473_v44 = vadd.f32 1.0, %v2140_v60 }
 0x58f   : > { %v2142_v37 = vpop.eup %2141  ;;  %2157 = vpow2.f32 %v1450_v36  ;;  %v1452_v4 = vmul.f32 1.442695, %v1421_v62  ;;  %v1381_v20 = vpop.xlane.xlu0 %1380  ;;  %v1422_v42 = vsub.f32 0.0, %v1403_v56 }
 0x590   : > { %v2144_v21 = vpop.eup %2143  ;;  %2159 = vrcp.f32 %v1470_v43  ;;  %v1476_v5 = vadd.f32 1.0, %v2142_v37  ;;  %v1406_v0 = vadd.f32 %v2915_v55, %v1381_v20 }
 0x591   : > { %v2146_v38 = vpop.eup %2145  ;;  %2161 = vpow2.f32 %v1452_v4  ;;  %1526 = vperm.xlu1 %2015, %v2144_v21   ;;  %v1383_v41 = vpop.xlane.xlu1 %1382  ;;  %v1454_v17 = vmul.f32 1.442695, %v1422_v42 }
 0x592   : > { %v2148_v11 = vpop.eup %2147  ;;  %2163 = vrcp.f32 %v1476_v5  ;;  %v1425_v12 = vsub.f32 0.0, %v1406_v0  ;;  %v1471_v34 = vadd.f32 1.0, %v2146_v38  ;;  %v1407_v6 = vadd.f32 %v2915_v55, %v1383_v41 }
 0x593   : > { %1531 = vperm.xlu0 %2016, %v2148_v11   ;;  %v1385_v13 = vpop.xlane.xlu0 %1384  ;;  %v2150_v10 = vpop.eup %2149  ;;  %2165 = vpow2.f32 %v1446_v40 }
 0x594   : > { %v1460_v27 = vmul.f32 1.442695, %v1425_v12  ;;  %v1408_v45 = vadd.f32 %v2915_v55, %v1385_v13  ;;  %v2152_v3 = vpop.eup %2151  ;;  %2167 = vrcp.f32 %v1473_v44  ;;  %v1426_v32 = vsub.f32 0.0, %v1407_v6 }
 0x595   : > { %1541 = vperm.xlu1 %2015, %v2150_v10   ;;  %v1474_v15 = vadd.f32 1.0, %v2152_v3 }
 0x596   : > { %2169 = vpow2.f32 %v1460_v27  ;;  %v1427_v8 = vsub.f32 0.0, %v1408_v45  ;;  %v1462_v52 = vmul.f32 1.442695, %v1426_v32 }
 0x597   : > { %v2154_v39 = vpop.eup %2153  ;;  %2171 = vpow2.f32 %v1458_v26 }
 0x598   : > { %v2156_v31 = vpop.eup %2155  ;;  %v1480_v16 = vadd.f32 1.0, %v2154_v39  ;;  %2173 = vrcp.f32 %v1471_v34  ;;  %v1464_v33 = vmul.f32 1.442695, %v1427_v8 }
 0x599   : > { %v2158_v14 = vpop.eup %2157  ;;  %1556 = vperm.xlu1 %2015, %v2156_v31  }
 0x59a   : > { %v2160_v24 = vpop.eup %2159  ;;  %2175 = vrcp.f32 %v1480_v16  ;;  %v1477_v48 = vadd.f32 1.0, %v2158_v14 }
 0x59b   : > { %v2162_v36 = vpop.eup %2161  ;;  %2177 = vpow2.f32 %v1464_v33 }
 0x59c   : > { %v2164_v55 = vpop.eup %2163  ;;  %v1478_v51 = vadd.f32 1.0, %v2162_v36  ;;  %2179 = vpow2.f32 %v1454_v17 }
 0x59d   : > { %2181 = vrcp.f32 %v1474_v15  ;;  %1546 = vperm.xlu1 %2015, %v2160_v24   ;;  %1576 = vperm.xlu0 %2016, %v2164_v55   ;;  %v2166_v35 = vpop.eup %2165 }
 0x59e   : > { %2183 = vrcp.f32 %v1478_v51  ;;  %v2168_v43 = vpop.eup %2167  ;;  %v1475_v62 = vadd.f32 1.0, %v2166_v35 }
 0x59f   : > { %2185 = vpow2.f32 %v1462_v52 }
 0x5a0   : > { %v2170_v61 = vpop.eup %2169  ;;  %2187 = vrcp.f32 %v1477_v48 }
 0x5a1   : > { %1561 = vperm.xlu1 %2015, %v2168_v43   ;;  %v2172_v58 = vpop.eup %2171  ;;  %v1482_v60 = vadd.f32 1.0, %v2170_v61 }
 0x5a2   : > { %v2174_v37 = vpop.eup %2173  ;;  %v1481_v21 = vadd.f32 1.0, %v2172_v58 }
 0x5a3   : > { %2189 = vrcp.f32 %v1482_v60 }
 0x5a4   : > { %v2176_v2 = vpop.eup %2175  ;;  %2191 = vrcp.f32 %v1475_v62 }
 0x5a5   : > { %v2178_v4 = vpop.eup %2177  ;;  %1551 = vperm.xlu1 %2015, %v2174_v37   ;;  %1596 = vperm.xlu0 %2016, %v2176_v2  }
 0x5a6   : > { %v2180_v20 = vpop.eup %2179  ;;  %v1484_v5 = vadd.f32 1.0, %v2178_v4 }
 0x5a7   : > { %v2182_v56 = vpop.eup %2181  ;;  %v1479_v38 = vadd.f32 1.0, %v2180_v20 }
 0x5a8   : > { %v2184_v0 = vpop.eup %2183  ;;  %2193 = vrcp.f32 %v1484_v5 }
 0x5a9   : > { %1566 = vperm.xlu1 %2015, %v2182_v56   ;;  %1586 = vperm.xlu0 %2016, %v2184_v0   ;;  %2195 = vrcp.f32 %v1481_v21  ;;  %v2186_v40 = vpop.eup %2185 }
 0x5aa   : > { %v2188_v11 = vpop.eup %2187  ;;  %2197 = vrcp.f32 %v1479_v38  ;;  %v1483_v12 = vadd.f32 1.0, %v2186_v40 }
 0x5ac   : > { %2199 = vrcp.f32 %v1483_v12 }
 0x5ad   : > { %1581 = vperm.xlu1 %2015, %v2188_v11   ;;  %v2190_v44 = vpop.eup %2189 }
 0x5ae   : > { %1606 = vperm.xlu0 %2016, %v2190_v44   ;;  %v2192_v41 = vpop.eup %2191 }
 0x5b1   : > { %1571 = vperm.xlu1 %2015, %v2192_v41  }
 0x5b2   : > { %v2194_v13 = vpop.eup %2193 }
 0x5b3   : > { %1616 = vperm.xlu0 %2016, %v2194_v13   ;;  %v2196_v10 = vpop.eup %2195 }
 0x5b4   : > { %v2198_v26 = vpop.eup %2197 }
 0x5b5   : > { %1601 = vperm.xlu1 %2015, %v2196_v10  }
 0x5b6   : > { %v2200_v42 = vpop.eup %2199 }
 0x5b9   : > { %1591 = vperm.xlu1 %2015, %v2198_v26  }
 0x5bd   : > { %1611 = vperm.xlu1 %2015, %v2200_v42  }
 0x60c   : > { %v1537_v27 = vpop.permute.xlu1 %1536 }
 0x60d   : > { %v1621_v34 = vsel %vm1523_vm3, %v1537_v27, %v2821_v28 }
 0x60e   : > { %1640 = vst [vmem:[%s2942_s25 + $0x10] sm:$0xff] %v1621_v34 }
 0x610   : > { %v1527_v6 = vpop.permute.xlu1 %1526 }
 0x611   : > { %v1619_v45 = vsel %vm1523_vm3, %v1527_v6, %v2823_v22 }
 0x612   : > { %1638 = vst [vmem:[%s2942_s25] sm:$0xff] %v1619_v45  ;;  %v1532_v3 = vpop.permute.xlu0 %1531 }
 0x613   : > { %v1620_v39 = vsel %vm1523_vm3, %v1532_v3, %v2829_v23 }
 0x614   : > { %1639 = vst [vmem:[%s2942_s25 + $0x8] sm:$0xff] %v1620_v39  ;;  %v1542_v8 = vpop.permute.xlu1 %1541 }
 0x615   : > { %v1622_v28 = vsel %vm1523_vm3, %v1542_v8, %v2825_v18 }
 0x616   : > { %1641 = vst [vmem:[%s2942_s25 + $0x18] sm:$0xff] %v1622_v28 }
 0x618   : > { %v1557_v31 = vpop.permute.xlu1 %1556 }
 0x619   : > { %v1625_v22 = vsel %vm1523_vm3, %v1557_v31, %v2839_v7 }
 0x61a   : > { %1644 = vst [vmem:[%s2942_s25 + $0x30] sm:$0xff] %v1625_v22 }
 0x61c   : > { %v1547_v16 = vpop.permute.xlu1 %1546  ;;  %v1577_v17 = vpop.permute.xlu0 %1576 }
 0x61d   : > { %v1623_v23 = vsel %vm1523_vm3, %v1547_v16, %v2843_v9  ;;  %v1629_v14 = vsel %vm1523_vm3, %v1577_v17, %v2859_v46 }
 0x61e   : > { %1642 = vst [vmem:[%s2942_s25 + $0x20] sm:$0xff] %v1623_v23  ;;  %1648 = vst [vmem:[%s2942_s25 + $0x50] sm:$0xff] %v1629_v14 }
 0x620   : > { %v1562_v18 = vpop.permute.xlu1 %1561 }
 0x621   : > { %v1626_v7 = vsel %vm1523_vm3, %v1562_v18, %v2845_v63 }
 0x622   : > { %1645 = vst [vmem:[%s2942_s25 + $0x38] sm:$0xff] %v1626_v7 }
 0x624   : > { %v1552_v15 = vpop.permute.xlu1 %1551  ;;  %v1597_v32 = vpop.permute.xlu0 %1596 }
 0x625   : > { %v1624_v9 = vsel %vm1523_vm3, %v1552_v15, %v2849_v25  ;;  %v1633_v46 = vsel %vm1523_vm3, %v1597_v32, %v2879_v50 }
 0x626   : > { %1643 = vst [vmem:[%s2942_s25 + $0x28] sm:$0xff] %v1624_v9  ;;  %1652 = vst [vmem:[%s2942_s25 + $0x70] sm:$0xff] %v1633_v46 }
 0x628   : > { %v1567_v33 = vpop.permute.xlu1 %1566  ;;  %v1587_v24 = vpop.permute.xlu0 %1586 }
 0x629   : > { %v1627_v63 = vsel %vm1523_vm3, %v1567_v33, %v2863_v1  ;;  %v1631_v36 = vsel %vm1523_vm3, %v1587_v24, %v2883_v19 }
 0x62a   : > { %1646 = vst [vmem:[%s2942_s25 + $0x40] sm:$0xff] %v1627_v63  ;;  %1650 = vst [vmem:[%s2942_s25 + $0x60] sm:$0xff] %v1631_v36 }
 0x62c   : > { %v1582_v25 = vpop.permute.xlu1 %1581 }
 0x62d   : > { %v1630_v50 = vsel %vm1523_vm3, %v1582_v25, %v2865_v30  ;;  %v1607_v55 = vpop.permute.xlu0 %1606 }
 0x62e   : > { %1649 = vst [vmem:[%s2942_s25 + $0x58] sm:$0xff] %v1630_v50  ;;  %v1635_v51 = vsel %vm1523_vm3, %v1607_v55, %v2900_v54 }
 0x62f   : > { %1654 = vst [vmem:[%s2942_s25 + $0x80] sm:$0xff] %v1635_v51 }
 0x630   : > { %v1572_v1 = vpop.permute.xlu1 %1571 }
 0x631   : > { %v1628_v19 = vsel %vm1523_vm3, %v1572_v1, %v2869_v57 }
 0x632   : > { %1647 = vst [vmem:[%s2942_s25 + $0x48] sm:$0xff] %v1628_v19  ;;  %v1617_v52 = vpop.permute.xlu0 %1616 }
 0x633   : > { %v1637_v30 = vsel %vm1523_vm3, %v1617_v52, %v2902_v29 }
 0x634   : > { %1656 = vst [vmem:[%s2942_s25 + $0x90] sm:$0xff] %v1637_v30  ;;  %v1602_v48 = vpop.permute.xlu1 %1601 }
 0x635   : > { %v1634_v35 = vsel %vm1523_vm3, %v1602_v48, %v2885_v53 }
 0x636   : > { %1653 = vst [vmem:[%s2942_s25 + $0x78] sm:$0xff] %v1634_v35 }
 0x638   : > { %v1592_v54 = vpop.permute.xlu1 %1591 }
 0x639   : > { %v1632_v43 = vsel %vm1523_vm3, %v1592_v54, %v2889_v59 }
 0x63a   : > { %1651 = vst [vmem:[%s2942_s25 + $0x68] sm:$0xff] %v1632_v43 }
 0x63c   : > { %v1612_v57 = vpop.permute.xlu1 %1611 }
 0x63d   : > { %v1636_v61 = vsel %vm1523_vm3, %v1612_v57, %v2904_v49 }
 0x63e   : > { %1655 = vst [vmem:[%s2942_s25 + $0x88] sm:$0xff] %v1636_v61 }
 0x63f PF: > { %s13_s12 = sadd.s32 1, %s2207_s12  }
 0x640   : > { %p10_p4 = scmp.ge.s32.totalorder %s13_s12, 4  }
 0x642   :  { %12 = sbr.rel (!%p10_p4) target bundleno = 1 (0x1), region = 62 }

</bundles_post_ra>
